<compile_context>
chip_gen: v7x
topology: tpu7x:2x2x1
jax: 0.10.0
libtpu: 0.0.40
codegen_flags: <defaults>
</compile_context>

<pallas_src>
import functools
import numpy as np

import jax
import jax.numpy as jnp
from jax.experimental import pallas as pl
from jax.experimental.pallas import tpu as pltpu

_EPS = 1e-5
_VMEM_CAP = 48 * 1024 * 1024          # <= v7x 64 MiB physical VMEM per TensorCore


def _ru(x, m):
    return ((x + m - 1) // m) * m


def _relu(x):
    return jnp.maximum(x, 0.0)


# ---------------------------------------------------------------------------
# Pallas kernel 1: tiled matmul with fused per-output-column scale/bias/ReLU.
# A/B are fed to the MXU in bf16, accumulation and epilogue are f32.
# Used for every conv (via im2col / 1x1 reshape), the qkv transform and the
# non-local "fuse" matmuls.
# ---------------------------------------------------------------------------
def _matmul_kernel(a_ref, b_ref, s_ref, c_ref, o_ref, *, relu):
    acc = jnp.dot(a_ref[...], b_ref[...], preferred_element_type=jnp.float32)
    acc = acc * s_ref[...] + c_ref[...]
    if relu:
        acc = jnp.maximum(acc, 0.0)
    o_ref[...] = acc.astype(o_ref.dtype)


@functools.lru_cache(maxsize=None)
def _matmul_call(Mp, Kp, Np, bm, relu, out_dtype):
    # double-buffered A/out blocks + resident (but double-buffered) B + acc temp
    need = (2 * bm * Kp * 2 + 2 * Kp * Np * 2 + 2 * bm * Np * 4
            + bm * Np * 4 + 4 * Np * 4 + (4 << 20))
    vmem = int(min(_VMEM_CAP, max(16 * 1024 * 1024, need)))
    call = pl.pallas_call(
        functools.partial(_matmul_kernel, relu=relu),
        grid=(Mp // bm,),
        in_specs=[
            pl.BlockSpec((bm, Kp), lambda i: (i, 0)),
            pl.BlockSpec((Kp, Np), lambda i: (0, 0)),
            pl.BlockSpec((1, Np), lambda i: (0, 0)),
            pl.BlockSpec((1, Np), lambda i: (0, 0)),
        ],
        out_specs=pl.BlockSpec((bm, Np), lambda i: (i, 0)),
        out_shape=jax.ShapeDtypeStruct((Mp, Np), np.dtype(out_dtype)),
        compiler_params=pltpu.CompilerParams(
            dimension_semantics=("parallel",),
            vmem_limit_bytes=vmem,
        ),
    )
    return jax.jit(call)


def matmul(a, b, scale=None, bias=None, relu=False, bm=512, out_dtype=jnp.float32):
    a = a.astype(jnp.bfloat16)
    b = b.astype(jnp.bfloat16)
    M, K = a.shape
    K2, N = b.shape
    assert K == K2
    bm = min(bm, _ru(M, 128))
    Mp, Kp, Np = _ru(M, bm), _ru(K, 128), _ru(N, 128)
    # Most layer shapes are already aligned, so these pads are usually no-ops.
    a_p = a if (Mp == M and Kp == K) else jnp.pad(a, ((0, Mp - M), (0, Kp - K)))
    b_p = b if (Kp == K and Np == N) else jnp.pad(b, ((0, Kp - K), (0, Np - N)))
    s = jnp.ones((N,), jnp.float32) if scale is None else \
        jnp.broadcast_to(scale, (N,)).astype(jnp.float32)
    c = jnp.zeros((N,), jnp.float32) if bias is None else \
        jnp.broadcast_to(bias, (N,)).astype(jnp.float32)
    s_p = jnp.pad(s, (0, Np - N)).reshape(1, Np)
    c_p = jnp.pad(c, (0, Np - N)).reshape(1, Np)
    out = _matmul_call(Mp, Kp, Np, bm, bool(relu), np.dtype(out_dtype).name)(
        a_p, b_p, s_p, c_p)
    return out[:M, :N]


# ---------------------------------------------------------------------------
# Pallas kernel 2: blocked axial-attention core.  One grid step processes TB
# (batch*group) slices:
#   s  = q^T k          (TB, L, L)   -- VPU outer products (cq <= 8, no padding)
#   p  = softmax(s, -1)
#   sv = v p^T          (TB, gp, L)  -- VPU multiply + lane reductions
# (the per-group bn_similarity scale is pre-folded into q; its bias is a
#  softmax no-op and dropped.)
# ---------------------------------------------------------------------------
def _attn_kernel(q_ref, k_ref, v_ref, o_ref):
    q = q_ref[...].astype(jnp.float32)            # (TB, cq, L)
    k = k_ref[...].astype(jnp.float32)            # (TB, cq, L)
    v = v_ref[...].astype(jnp.float32)            # (TB, gp, L)
    # s[b, i, j] = sum_c q[b, c, i] * k[b, c, j]
    s = jnp.sum(q[:, :, :, None] * k[:, :, None, :], axis=1)          # (TB, L, L)
    s = s - jnp.max(s, axis=-1, keepdims=True)
    e = jnp.exp(s)
    p = e / jnp.sum(e, axis=-1, keepdims=True)
    # sv[b, c, i] = sum_j p[b, i, j] * v[b, c, j]
    o_ref[...] = jnp.sum(p[:, None, :, :] * v[:, :, None, :], axis=-1)  # (TB, gp, L)


@functools.lru_cache(maxsize=None)
def _attn_call(Bp, cq, gp, L, tb):
    call = pl.pallas_call(
        _attn_kernel,
        grid=(Bp // tb,),
        in_specs=[
            pl.BlockSpec((tb, cq, L), lambda b: (b, 0, 0)),
            pl.BlockSpec((tb, cq, L), lambda b: (b, 0, 0)),
            pl.BlockSpec((tb, gp, L), lambda b: (b, 0, 0)),
        ],
        out_specs=pl.BlockSpec((tb, gp, L), lambda b: (b, 0, 0)),
        out_shape=jax.ShapeDtypeStruct((Bp, gp, L), jnp.float32),
        compiler_params=pltpu.CompilerParams(
            dimension_semantics=("parallel",),
            vmem_limit_bytes=_VMEM_CAP,
        ),
    )
    return jax.jit(call)


def attention_core(q, k, v):
    """q, k: (Bg, cq, L); v: (Bg, gp, L)  ->  (Bg, gp, L) float32."""
    Bg, cq, L = q.shape
    gp = v.shape[1]
    tb = 64 if L >= 64 else 128          # keep (TB, L, L) temps comfortably in VMEM
    tb = min(tb, _ru(Bg, 8))
    Bp = _ru(Bg, tb)
    q = q.astype(jnp.bfloat16)
    k = k.astype(jnp.bfloat16)
    v = v.astype(jnp.bfloat16)
    if Bp != Bg:
        pad = ((0, Bp - Bg), (0, 0), (0, 0))
        q, k, v = jnp.pad(q, pad), jnp.pad(k, pad), jnp.pad(v, pad)
    out = _attn_call(Bp, cq, gp, L, tb)(q, k, v)
    return out[:Bg]


# ---------------------------------------------------------------------------
# Glue: NHWC im2col conv, bilinear upsample, avg pool.
# ---------------------------------------------------------------------------
def _im2col(x, kh, kw, stride, pad):
    # x: (N, H, W, C) bf16  ->  (N*Ho*Wo, kh*kw*C) bf16
    N, H, W, C = x.shape
    Ho = (H + 2 * pad - kh) // stride + 1
    Wo = (W + 2 * pad - kw) // stride + 1
    if pad:
        x = jnp.pad(x, ((0, 0), (pad, pad), (pad, pad), (0, 0)))
    cols = []
    for i in range(kh):
        for j in range(kw):
            cols.append(x[:, i:i + stride * Ho:stride, j:j + stride * Wo:stride, :])
    cols = jnp.concatenate(cols, axis=-1)
    return cols.reshape(N * Ho * Wo, kh * kw * C), Ho, Wo


def conv2d(x, w, b=None, stride=1, padding=0, bn=None, relu=False):
    # x: (N, H, W, Cin) ; w: (Cout, Cin, kh, kw) (PyTorch layout)
    N, H, W, C = x.shape
    Cout, Cin, kh, kw = w.shape
    x = x.astype(jnp.bfloat16)
    if kh == 1 and kw == 1 and padding == 0:
        if stride > 1:
            x = x[:, ::stride, ::stride, :]
        Ho, Wo = x.shape[1], x.shape[2]
        cols = x.reshape(N * Ho * Wo, C)
        wm = w.reshape(Cout, Cin).T
    else:
        cols, Ho, Wo = _im2col(x, kh, kw, stride, padding)
        wm = jnp.transpose(w, (2, 3, 1, 0)).reshape(kh * kw * Cin, Cout)
    scale = jnp.ones((Cout,), jnp.float32)
    bias = jnp.zeros((Cout,), jnp.float32) if b is None else b.astype(jnp.float32)
    if bn is not None:
        s_bn, b_bn = bn
        scale = scale * s_bn
        bias = bias * s_bn + b_bn
    out = matmul(cols, wm, scale=scale, bias=bias, relu=relu)
    return out.reshape(N, Ho, Wo, Cout)


def upsample2(x):
    # F.interpolate(scale_factor=2, mode='bilinear', align_corners=False)
    N, H, W, C = x.shape
    return jax.image.resize(x, (N, 2 * H, 2 * W, C), method="bilinear")


def avg_pool(x, s):
    N, H, W, C = x.shape
    return x.reshape(N, H // s, s, W // s, s, C).mean(axis=(2, 4))


# ---------------------------------------------------------------------------
# Axial attention (AxialAttention_wopos semantics) on NHWC tensors.
# ---------------------------------------------------------------------------
def axial_attention(x, p, width, stride):
    groups = p["groups"]
    out_planes = p["out_planes"]
    gp = out_planes // groups
    cq = gp // 2
    N, H, W, C = x.shape
    xb = x.astype(jnp.bfloat16)
    if width:
        B_, L = N * H, W
        xm = xb.reshape(B_ * L, C)                                  # rows (n, h, w)
    else:
        B_, L = N * W, H
        xm = jnp.transpose(xb, (0, 2, 1, 3)).reshape(B_ * L, C)     # rows (n, w, h)

    # bn_qkv epilogue; fold the per-group bn_similarity *scale* into the q
    # channels (the bn_similarity bias is constant along the softmax axis -> no-op).
    s_qkv, b_qkv = p["bn_qkv"]
    s_sim, _b_sim = p["bn_sim"]
    ch = jnp.arange(2 * out_planes)
    mult = jnp.where(ch % (2 * gp) < cq, s_sim[ch // (2 * gp)], 1.0)
    qkv = matmul(xm, p["w_qkv"].T, scale=s_qkv * mult, bias=b_qkv * mult,
                 out_dtype=jnp.bfloat16)                            # (B_*L, 2*out)

    qkv = qkv.reshape(B_, L, groups, 2 * gp)
    qkv = jnp.transpose(qkv, (0, 2, 3, 1)).reshape(B_ * groups, 2 * gp, L)
    q = qkv[:, :cq, :]
    k = qkv[:, cq:2 * cq, :]
    v = qkv[:, 2 * cq:, :]

    sv = attention_core(q, k, v)                                    # (Bg, gp, L) f32
    sv = sv.reshape(B_, out_planes, L)
    s_out, b_out = p["bn_out"]
    sv = sv * s_out[None, :, None] + b_out[None, :, None]

    if width:
        out = jnp.transpose(sv.reshape(N, H, out_planes, L), (0, 1, 3, 2))
    else:
        out = jnp.transpose(sv.reshape(N, W, out_planes, L), (0, 3, 1, 2))
    if stride > 1:
        out = avg_pool(out, stride)
    return out


def axial_block(x, p, stride, ds):
    # TODO(synk): ColAttention/RowAttention of AxialBlock_dynamic are not defined in
    # the provided source; AxialAttention_wopos semantics are used for both families.
    out = conv2d(x, p["conv_down"], bn=p["bn1"], relu=True)
    out = axial_attention(out, p["attn_h"], width=False, stride=1)
    out = axial_attention(out, p["attn_w"], width=True, stride=stride)
    out = _relu(out)
    out = conv2d(out, p["conv_up"], bn=p["bn2"])
    identity = x if ds is None else conv2d(x, ds["w"], stride=ds["stride"], bn=ds["bn"])
    return _relu(out + identity)


# ---------------------------------------------------------------------------
# Non-local fusion block (self.fuse).  y = theta^T (phi w^T) / N  - exactly the
# reference (theta^T phi / N) w^T reassociated, so the (HW, HW) intermediate is
# never materialized.
# ---------------------------------------------------------------------------
def fuse(x, a, p):
    B, H, W, C = x.shape
    inter = p["w_w"].shape[0]
    HWx = H * W
    Ca = a.shape[3]
    HWa = a.shape[1] * a.shape[2]

    # w(x) and theta(x) share their input -> one lane-dense matmul.
    wt_w = jnp.concatenate([p["w_w"].reshape(inter, C),
                            p["theta_w"].reshape(inter, C)], axis=0)
    wt_b = jnp.concatenate([p["w_b"], p["theta_b"]], axis=0)
    wt = matmul(x.reshape(B * HWx, C), wt_w.T, bias=wt_b)           # (B*HW, 2*inter)
    w_x = wt[:, :inter].reshape(B, HWx, inter)
    theta_x = wt[:, inter:].reshape(B, HWx, inter)
    phi_x = matmul(a.reshape(B * HWa, Ca), p["phi_w"].reshape(inter, Ca).T,
                   bias=p["phi_b"]).reshape(B, HWa, inter)

    inv_n = jnp.full((inter,), 1.0 / HWa, jnp.float32)
    ys = []
    for bi in range(B):
        m = matmul(phi_x[bi].T, w_x[bi], scale=inv_n)               # (inter, inter)
        ys.append(matmul(theta_x[bi], m))                           # (HW, inter)
    y = jnp.stack(ys, axis=0).reshape(B * HWx, inter)
    w_y = matmul(y, p["miu_w"].reshape(C, inter).T, bias=p["miu_b"])
    return w_y.reshape(B, H, W, C) + x


def sam_encoder_stub(key, B, hs, ws):
    # TODO(synk): SAM ViT-B image encoder (external checkpoint + cv2 preprocessing)
    # cannot be reproduced here; replaced with a deterministic synthetic embedding.
    return jax.random.normal(key, (B, hs, ws, 256), jnp.float32) * 0.1


def local_branch(xp, P):
    t = conv2d(xp, P["conv1_p"], stride=2, padding=3, bn=P["bn1_p"], relu=True)
    t = conv2d(t, P["conv2_p"], padding=1, bn=P["bn2_p"], relu=True)
    t = conv2d(t, P["conv3_p"], padding=1, bn=P["bn3_p"], relu=True)
    # TODO(synk): ConvTransBlock (CTB1) has no definition in the provided source;
    # treated as identity.
    x1p = conv2d(t, P["conv_test1_w"], padding=1, bn=P["bn_test1"], relu=True)
    t = axial_block(x1p, P["layer2_p"][0], stride=2, ds=P["ds2_p"])
    x2p = axial_block(t, P["layer2_p"][1], stride=1, ds=None)
    t = axial_block(x2p, P["layer3_p"][0], stride=2, ds=P["ds3_p"])
    t = axial_block(t, P["layer3_p"][1], stride=1, ds=None)
    t = axial_block(t, P["layer3_p"][2], stride=1, ds=None)
    x3p = axial_block(t, P["layer3_p"][3], stride=1, ds=None)
    x4p = axial_block(x3p, P["layer4_p"], stride=2, ds=P["ds4_p"])
    t = _relu(upsample2(conv2d(x4p, P["dec1_p_w"], b=P["dec1_p_b"], stride=2, padding=1)))
    t = t + x4p
    t = _relu(upsample2(conv2d(t, P["dec2_p_w"], b=P["dec2_p_b"], padding=1)))
    t = t + x3p
    t = _relu(upsample2(conv2d(t, P["dec3_p_w"], b=P["dec3_p_b"], padding=1)))
    t = t + x2p
    t = _relu(upsample2(conv2d(t, P["dec4_p_w"], b=P["dec4_p_b"], padding=1)))
    t = t + x1p
    t = _relu(upsample2(conv2d(t, P["dec5_p_w"], b=P["dec5_p_b"], padding=1)))
    return t


# ---------------------------------------------------------------------------
# medt_net forward.
# ---------------------------------------------------------------------------
def medt_forward(x, P):
    # x: (N, 3, H, W) NCHW at the module boundary.
    x_nhwc = jnp.transpose(x, (0, 2, 3, 1)).astype(jnp.float32)
    B, H, W, _ = x_nhwc.shape

    # global branch
    t = conv2d(x_nhwc, P["conv1"], stride=2, padding=3, bn=P["bn1"], relu=True)
    t = conv2d(t, P["conv2"], padding=1, bn=P["bn2"], relu=True)
    t = conv2d(t, P["conv3"], padding=1, bn=P["bn3"], relu=True)
    sam_emb = sam_encoder_stub(P["sam_emb_key"], B, H // 2, W // 2)
    sam_t = conv2d(sam_emb, P["sam_tran_w"], b=P["sam_tran_b"], relu=True)
    t = fuse(sam_t, t, P["fuse"])
    # TODO(synk): feature-map dump (cv2.resize + plt.imsave) is a host-side
    # visualization side effect with no effect on the returned tensor; skipped.
    x1 = axial_block(t, P["layer1"], stride=1, ds=P["ds1"])
    t2 = axial_block(x1, P["layer2"][0], stride=2, ds=P["ds2"])
    x2 = axial_block(t2, P["layer2"][1], stride=1, ds=None)
    t = _relu(upsample2(conv2d(x2, P["dec4_w"], b=P["dec4_b"], padding=1)))
    t = t + x1
    t = _relu(upsample2(conv2d(t, P["dec5_w"], b=P["dec5_b"], padding=1)))
    x_glob = t                                                    # (B, H, W, 16)

    # local branch: the 4x4 patch loop iterations are independent -> batched.
    p = H // 4
    patches = []
    for i in range(4):
        for j in range(4):
            patches.append(x_nhwc[:, p * i:p * (i + 1), p * j:p * (j + 1), :])
    xp = jnp.concatenate(patches, axis=0)
    yp = local_branch(xp, P)
    rows, idx = [], 0
    for i in range(4):
        row = []
        for j in range(4):
            row.append(yp[idx * B:(idx + 1) * B])
            idx += 1
        rows.append(jnp.concatenate(row, axis=2))
    x_loc = jnp.concatenate(rows, axis=1)

    t = x_glob + x_loc
    t = _relu(conv2d(t, P["decf_w"], b=P["decf_b"], padding=1))
    t = conv2d(_relu(t), P["adjust_p_w"], b=P["adjust_p_b"])
    return jnp.transpose(t, (0, 3, 1, 2))                         # back to NCHW


# ---------------------------------------------------------------------------
# Deterministic parameter initialization (shapes from medt_net.__init__).
# ---------------------------------------------------------------------------
def init_params(key):
    keys = iter(jax.random.split(key, 512))

    def w(shape, scale=0.05):
        return jax.random.normal(next(keys), shape, jnp.float32) * scale

    def bvec(c):
        return jnp.zeros((c,), jnp.float32)

    def bn(c):
        s = jnp.full((c,), 1.0 / np.sqrt(1.0 + _EPS), jnp.float32)
        return (s, jnp.zeros((c,), jnp.float32))

    def attn(in_p, out_p, groups=8):
        return dict(w_qkv=w((2 * out_p, in_p), float(np.sqrt(1.0 / in_p))),
                    bn_qkv=bn(2 * out_p), bn_sim=bn(groups), bn_out=bn(out_p),
                    out_planes=out_p, groups=groups)

    def block(inplanes, planes, groups=8):
        width = planes                     # base_width = 64 -> width = planes
        return dict(conv_down=w((width, inplanes, 1, 1)), bn1=bn(width),
                    attn_h=attn(width, width, groups),
                    attn_w=attn(width, width, groups),
                    conv_up=w((planes * 2, width, 1, 1)), bn2=bn(planes * 2))

    def ds(in_c, out_c, stride):
        return dict(w=w((out_c, in_c, 1, 1)), bn=bn(out_c), stride=stride)

    P = dict(
        conv1=w((8, 3, 7, 7)), bn1=bn(8),
        conv2=w((128, 8, 3, 3)), bn2=bn(128),
        conv3=w((8, 128, 3, 3)), bn3=bn(8),
        sam_tran_w=w((8, 256, 1, 1)), sam_tran_b=bvec(8),
        fuse=dict(w_w=w((16, 8, 1, 1)), w_b=bvec(16),
                  theta_w=w((16, 8, 1, 1)), theta_b=bvec(16),
                  phi_w=w((16, 8, 1, 1)), phi_b=bvec(16),
                  miu_w=w((8, 16, 1, 1)), miu_b=bvec(8)),
        ds1=ds(8, 32, 1), ds2=ds(32, 64, 2),
        layer1=block(8, 16),
        layer2=[block(32, 32), block(64, 32)],
        dec4_w=w((32, 64, 3, 3)), dec4_b=bvec(32),
        dec5_w=w((16, 32, 3, 3)), dec5_b=bvec(16),
        conv1_p=w((64, 3, 7, 7)), bn1_p=bn(64),
        conv2_p=w((128, 64, 3, 3)), bn2_p=bn(128),
        conv3_p=w((64, 128, 3, 3)), bn3_p=bn(64),
        conv_test1_w=w((32, 64, 3, 3)), bn_test1=bn(32),
        ds2_p=ds(32, 64, 2), ds3_p=ds(64, 128, 2), ds4_p=ds(128, 256, 2),
        layer2_p=[block(32, 32), block(64, 32)],
        layer3_p=[block(64, 64), block(128, 64), block(128, 64), block(128, 64)],
        layer4_p=block(128, 128),
        dec1_p_w=w((256, 256, 3, 3)), dec1_p_b=bvec(256),
        dec2_p_w=w((128, 256, 3, 3)), dec2_p_b=bvec(128),
        dec3_p_w=w((64, 128, 3, 3)), dec3_p_b=bvec(64),
        dec4_p_w=w((32, 64, 3, 3)), dec4_p_b=bvec(32),
        dec5_p_w=w((16, 32, 3, 3)), dec5_p_b=bvec(16),
        decf_w=w((16, 16, 3, 3)), decf_b=bvec(16),
        adjust_p_w=w((2, 16, 1, 1)), adjust_p_b=bvec(2),
        sam_emb_key=next(keys),
    )
    return P


if __name__ == "__main__":
    key = jax.random.PRNGKey(0)
    kx, kp = jax.random.split(key)
    # Input spatial size 128 is the smallest consistent with the architecture
    # (4x4 local patches, 6 stride-2 stages inside each patch).
    x = jax.random.normal(kx, (1, 3, 128, 128), jnp.float32)
    P = init_params(kp)
    out = medt_forward(x, P)
    out = jax.block_until_ready(out)
    assert out.shape == (1, 2, 128, 128), out.shape
    assert bool(jnp.all(jnp.isfinite(out)))
    print("KERNEL_OK")
</pallas_src>

<mosaic_0001>
module attributes {stable_mosaic.version = 11 : i64} {
  func.func @_matmul_kernel(%arg0: i32, %arg1: memref<512x256xbf16, #tpu.memory_space<vmem>>, %arg2: memref<256x128xbf16, #tpu.memory_space<vmem>>, %arg3: memref<1x128xf32, #tpu.memory_space<vmem>>, %arg4: memref<1x128xf32, #tpu.memory_space<vmem>>, %arg5: memref<512x128xf32, #tpu.memory_space<vmem>>) attributes {dimension_semantics = [#tpu.dimension_semantics<parallel>], iteration_bounds = array<i64: 8>, scalar_prefetch = 0 : i64, scratch_operands = 0 : i64, tpu.core_type = #tpu.core_type<tc>, window_params = [{transform_indices = @transform_0, window_bounds = array<i64: 512, 256>}, {pipeline_mode = #tpu.pipeline_mode<synchronous>, transform_indices = @transform_1, window_bounds = array<i64: 256, 128>}, {pipeline_mode = #tpu.pipeline_mode<synchronous>, transform_indices = @transform_2, window_bounds = array<i64: 1, 128>}, {pipeline_mode = #tpu.pipeline_mode<synchronous>, transform_indices = @transform_3, window_bounds = array<i64: 1, 128>}, {transform_indices = @transform_4, window_bounds = array<i64: 512, 128>}]} {
    %c0 = arith.constant 0 : index
    %c0_0 = arith.constant 0 : index
    %0 = vector.load %arg1[%c0, %c0_0] : memref<512x256xbf16, #tpu.memory_space<vmem>>, vector<512x256xbf16>
    %c0_1 = arith.constant 0 : index
    %c0_2 = arith.constant 0 : index
    %1 = vector.load %arg2[%c0_1, %c0_2] : memref<256x128xbf16, #tpu.memory_space<vmem>>, vector<256x128xbf16>
    %cst = arith.constant dense<0.000000e+00> : vector<512x128xf32>
    %2 = tpu.matmul %0, %1, %cst {dimension_numbers = #tpu.dot_dimension_numbers<[1], [0], [0], [1], [0, 0, 1, 1], [], []>} : vector<512x256xbf16>, vector<256x128xbf16>, vector<512x128xf32> -> vector<512x128xf32>
    %c0_3 = arith.constant 0 : index
    %c0_4 = arith.constant 0 : index
    %3 = vector.load %arg3[%c0_3, %c0_4] : memref<1x128xf32, #tpu.memory_space<vmem>>, vector<1x128xf32>
    %4 = vector.broadcast %3 : vector<1x128xf32> to vector<512x128xf32>
    %5 = arith.mulf %2, %4 : vector<512x128xf32>
    %c0_5 = arith.constant 0 : index
    %c0_6 = arith.constant 0 : index
    %6 = vector.load %arg4[%c0_5, %c0_6] : memref<1x128xf32, #tpu.memory_space<vmem>>, vector<1x128xf32>
    %7 = vector.broadcast %6 : vector<1x128xf32> to vector<512x128xf32>
    %8 = arith.addf %5, %7 : vector<512x128xf32>
    %cst_7 = arith.constant 0.000000e+00 : f32
    %9 = vector.broadcast %cst_7 : f32 to vector<512x128xf32>
    %10 = arith.maximumf %8, %9 : vector<512x128xf32>
    %c0_8 = arith.constant 0 : index
    %c0_9 = arith.constant 0 : index
    %11 = vector.load %arg5[%c0_8, %c0_9] : memref<512x128xf32, #tpu.memory_space<vmem>>, vector<512x128xf32>
    tpu.vector_store %arg5[%c0_8, %c0_9], %10 {strides = array<i32>} : memref<512x128xf32, #tpu.memory_space<vmem>>, vector<512x128xf32>,
    return
  }
  func.func @transform_0(%arg0: i32) -> (i32, i32) {
    %c0_i32 = arith.constant 0 : i32
    %c0_i32_0 = arith.constant 0 : i32
    return %arg0, %c0_i32 : i32, i32
  }
  func.func @transform_1(%arg0: i32) -> (i32, i32) {
    %c0_i32 = arith.constant 0 : i32
    %c0_i32_0 = arith.constant 0 : i32
    %c0_i32_1 = arith.constant 0 : i32
    return %c0_i32, %c0_i32_0 : i32, i32
  }
  func.func @transform_2(%arg0: i32) -> (i32, i32) {
    %c0_i32 = arith.constant 0 : i32
    %c0_i32_0 = arith.constant 0 : i32
    %c0_i32_1 = arith.constant 0 : i32
    return %c0_i32, %c0_i32_0 : i32, i32
  }
  func.func @transform_3(%arg0: i32) -> (i32, i32) {
    %c0_i32 = arith.constant 0 : i32
    %c0_i32_0 = arith.constant 0 : i32
    %c0_i32_1 = arith.constant 0 : i32
    return %c0_i32, %c0_i32_0 : i32, i32
  }
  func.func @transform_4(%arg0: i32) -> (i32, i32) {
    %c0_i32 = arith.constant 0 : i32
    %c0_i32_0 = arith.constant 0 : i32
    return %arg0, %c0_i32 : i32, i32
  }
}

</mosaic_0001>

<bundles_post_ra>
// kernel: tpu_custom_call.1
= control target key start
LH: loop header
LB: loop body
LE: loop exit
PB: predicated region body
PF: predicated region fallthrough
CT: control target
= control target key end

     0   :  { %9 = vsyncpa [#allocation3], 0  ;;  %s2567_s0 = inlined_call_operand.hbm [shape: bf16[4096,256], index: 0, kind: input, shape index: {}]   ;;  %s2568_s1 = inlined_call_operand.hbm [shape: bf16[256,128], index: 1, kind: input, shape index: {}]   ;;  %s2569_s2 = inlined_call_operand.hbm [shape: f32[1,128], index: 2, kind: input, shape index: {}]   ;;  %s2570_s3 = inlined_call_operand.hbm [shape: f32[1,128], index: 3, kind: input, shape index: {}]   ;;  %s2571_s4 = inlined_call_operand.hbm [shape: f32[4096,128], index: 4, kind: output, shape index: {}]  }
   0x1   :  { %11 = vsyncpa [#allocation3 + $0x1], 0 }
   0x2   :  { %12 = vsyncpa [#allocation6], 0 }
   0x3   :  { %13 = vsyncpa [#allocation9], 0 }
   0x4   :  { %14 = vsyncpa [#allocation4], 0 }
   0x5   :  { %16 = vsyncpa [#allocation4 + $0x1], 0  ;;  %s2008_s15 = smov 0   ;;  %s2010_s16 = smov 0  }
   0x6   :  { %s2012_s17 = smov 0   ;;  %s2014_s18 = smov 0  }
   0x7 LB: > { %s2029_s19 = sadd.s32 4294967295, %s1969_s18   ;;  %s1447_s20 = sadd.s32 4294967294, %s1969_s18   ;;  %s1969_s18 = sphi %s2014_s18, %s2593_s18   ;;  %s1965_s17 = sphi %s2012_s17, %s2592_s17   ;;  %s1961_s16 = sphi %s2010_s16, %s2591_s16   ;;  %s1957_s15 = sphi %s2008_s15, %s2590_s15  }
   0x8   : > { %p42_p0 = scmp.ne.s32.totalorder %s1961_s16, %s1957_s15  ;;  %p2572_p1 = scmp.eq.s32.totalorder %s2029_s19, 0 }
   0x9   : > { %p135_p3 = scmp.eq.s32.totalorder %s1447_s20, 7  ;;  %p1448_p5 = scmp.ge.s32.totalorder %s1969_s18, 1 }
   0xa   : > { %p2038_p4 = por %p2572_p1, %p42_p0  ;;  %p142_p7 = scmp.lt.s32.totalorder %s1969_s18, 9 }
   0xb   : > { %p2043_p6 = por %p135_p3, %p42_p0  ;;  %s1971_s24 = smov [#allocation5]  }
   0xc   : > { %s2575_s21 = scalar_select %p2038_p4, 1, 0 }
   0xd   : > { %s2576_s22 = scalar_select %p2043_p6, 1, 0 }
   0xe   : > { %p2048_p8 = pnand %p1448_p5, %p142_p7  ;;  %s154_s25 = sshll.u32 %s1971_s24, 4  ;;  %s2052_s25 = int_to_ptr.vmem [resolvable:$true] %s154_s25 }
   0xf   : > { %s1972_s27 = smov [#allocation7]   ;;  %s1973_s29 = smov [#allocation8]  }
  0x10   : > { %s2577_s23 = scalar_select %p2048_p8, 1, 0 }
  0x11   : > { %p1601_p9 = pneg %p2048_p8  ;;  %s168_s28 = sshll.u32 %s1972_s27, 4  ;;  %s2062_s28 = int_to_ptr.vmem [resolvable:$true] %s168_s28 }
  0x12   : > { %s2064_s30 = sshll.u32 %s1973_s29, 4  ;;  %s1781_s7 = scalar_lea.hbm %s2568_s1, 2048  ;;  %s180_s30 = int_to_ptr.vmem [resolvable:$true] %s2064_s30 }
  0x13   : > { %p2058_p10 = pnand %p1601_p9, %p2572_p1  ;;  %p1782_p11 = scmp.ne.s32.totalorder %s2568_s1, %s1781_s7 }
  0x14   : > { %p1788_p3 = scmp.lt.u32.totalorder %s1781_s7, %s2568_s1 }
  0x15   : > { %p2074_p12 = pneg %p2058_p10 }
  0x17   : > { %p1784_p13 = pnand %p2074_p12, %p1782_p11 }
  0x19   : > { %p1785_p0 = pneg %p1784_p13 }
  0x1b   : > { %p1790_p5 = pnand %p1788_p3, %p1785_p0 }
  0x1d   : > { %1793 = shalt.err (!%p1790_p5)
}
  0x1e   : > { %s1794_s13 = scalar_lea.vmem %s2052_s25, 2048  ;;  %p1802_p2 = scmp.lt.s32.totalorder %s2052_s25, %s2052_s25 }
  0x1f   : > { %p1795_p7 = scmp.ne.s32.totalorder %s2052_s25, %s1794_s13  ;;  %p1803_p6 = scmp.lt.s32.totalorder %s1794_s13, %s1794_s13 }
  0x21   : > { %p1797_p9 = pnand %p1795_p7, %p2074_p12  ;;  %p1804_p11 = por %p1803_p6, %p1802_p2 }
  0x23   : > { %p1798_p1 = pneg %p1797_p9 }
  0x25   : > { %p1805_p13 = pnand %p1804_p11, %p1798_p1 }
  0x27   : > { %1808 = shalt.err (!%p1805_p13)
}
  0x28   : > { %s1974_s14 = smov 64   ;;  %s1975_s20 = smov 4  }
  0x29   : > { %1604 = dma.hbm_to_vmem [thread:$0]  (!%p2058_p10), %s2568_s1, 2048, %s2052_s25, [#allocation6], %s1974_s14, %s1974_s14, %s1975_s20  }
  0x2a   : > { %s1809_s6 = scalar_lea.hbm %s2569_s2, 16 }
  0x2b   : > { %p1810_p2 = scmp.ne.s32.totalorder %s2569_s2, %s1809_s6  ;;  %p1816_p0 = scmp.lt.u32.totalorder %s1809_s6, %s2569_s2 }
  0x2d   : > { %p1812_p1 = pnand %p1810_p2, %p2074_p12 }
  0x2f   : > { %p1813_p6 = pneg %p1812_p1 }
  0x31   : > { %p1818_p3 = pnand %p1816_p0, %p1813_p6 }
  0x33   : > { %1821 = shalt.err (!%p1818_p3)
}
  0x34   : > { %s1822_s25 = scalar_lea.vmem %s2062_s28, 16  ;;  %s1829_s12 = scalar_lea.vmem %s2062_s28, 32 }
  0x35   : > { %p1823_p5 = scmp.ne.s32.totalorder %s2062_s28, %s1822_s25  ;;  %p1830_p11 = scmp.lt.s32.totalorder %s2062_s28, %s2062_s28 }
  0x36   : > { %p1831_p13 = scmp.lt.s32.totalorder %s1829_s12, %s1822_s25 }
  0x37   : > { %p1825_p7 = pnand %p1823_p5, %p2074_p12 }
  0x38   : > { %p1832_p2 = por %p1831_p13, %p1830_p11 }
  0x39   : > { %p1826_p9 = pneg %p1825_p7 }
  0x3b   : > { %p1833_p1 = pnand %p1832_p2, %p1826_p9 }
  0x3d   : > { %1836 = shalt.err (!%p1833_p1)
}
  0x3e   : > { %1607 = dma.hbm_to_vmem [thread:$0]  (!%p2058_p10), %s2569_s2, 16, %s2062_s28, [#allocation6]  }
  0x3f   : > { %s1837_s27 = scalar_lea.hbm %s2570_s3, 16 }
  0x40   : > { %p1838_p6 = scmp.ne.s32.totalorder %s2570_s3, %s1837_s27  ;;  %p1844_p5 = scmp.lt.u32.totalorder %s1837_s27, %s2570_s3 }
  0x42   : > { %p1840_p0 = pnand %p1838_p6, %p2074_p12 }
  0x44   : > { %p1841_p3 = pneg %p1840_p0 }
  0x46   : > { %p1846_p7 = pnand %p1844_p5, %p1841_p3 }
  0x48   : > { %1849 = shalt.err (!%p1846_p7)
}
  0x49   : > { %s1850_s8 = scalar_lea.vmem %s180_s30, 16  ;;  %s1857_s28 = scalar_lea.vmem %s180_s30, 32 }
  0x4a   : > { %p1851_p9 = scmp.ne.s32.totalorder %s180_s30, %s1850_s8  ;;  %p1858_p2 = scmp.lt.s32.totalorder %s180_s30, %s180_s30 }
  0x4b   : > { %p1859_p1 = scmp.lt.s32.totalorder %s1857_s28, %s1850_s8 }
  0x4c   : > { %p1853_p11 = pnand %p1851_p9, %p2074_p12 }
  0x4d   : > { %p1860_p4 = por %p1859_p1, %p1858_p2 }
  0x4e   : > { %p1854_p13 = pneg %p1853_p11 }
  0x50   : > { %p1861_p8 = pnand %p1860_p4, %p1854_p13 }
  0x52   : > { %1864 = shalt.err (!%p1861_p8)
}
  0x53   : > { %1610 = dma.hbm_to_vmem [thread:$0]  (!%p2058_p10), %s2570_s3, 16, %s180_s30, [#allocation9]  }
  0x54   : > { %s2139_s10 = sadd.s32 1, %s1969_s18   ;;  %s29_s26 = sadd.s32 1, %s1965_s17 }
  0x55   : > { %s26_s25 = ssub.s32 %s1969_s18, %s2139_s10  ;;  %p36_p8 = scmp.ne.s32.totalorder %s1965_s17, %s1961_s16 }
  0x56   : > { %p27_p4 = scmp.eq.s32.totalorder %s26_s25, 0  ;;  %p37_p12 = scmp.eq.s32.totalorder %s1969_s18, 0 }
  0x57   : > { %p1622_p6 = scmp.lt.s32.totalorder %s1969_s18, 8  ;;  %p2580_p3 = scmp.eq.s32.totalorder %s2029_s19, 7 }
  0x58   : > { %s2149_s12 = scalar_select %p27_p4, %s1965_s17, %s29_s26  }
  0x59   : > { %p38_p0 = por %p37_p12, %p36_p8  ;;  %p2153_p5 = por %p2580_p3, %p36_p8 }
  0x5a   : > { %s190_s14 = sand.u32 1, %s1965_s17   ;;  %s1551_s20 = sshll.u32 %s1969_s18, 13 }
  0x5b   : > { %s1453_s30 = sshll.u32 %s190_s14, 9  ;;  %s2162_s29 = scalar_lea.hbm %s2567_s0, %s1551_s20 }
  0x5c   : > { %s194_s5 = scalar_lea.vmem [#allocation2], %s1453_s30  ;;  %p2164_p10 = pnand %p1622_p6, %p38_p0 }
  0x5d   : > { %s202_s6 = sshll.u32 %s194_s5, 4  ;;  %s2170_s8 = scalar_lea.sflag [#allocation3], %s190_s14  ;;  %s2168_s6 = int_to_ptr.vmem [resolvable:$true] %s202_s6 }
  0x5e   : > { %s1865_s28 = scalar_lea.hbm %s2162_s29, 8192  ;;  %p1867_p9 = pneg %p2164_p10 }
  0x5f   : > { %p1866_p7 = scmp.ne.s32.totalorder %s2162_s29, %s1865_s28  ;;  %s1870_s25 = scalar_lea.hbm %s2567_s0, 65536 }
  0x60   : > { %p1871_p2 = scmp.lt.u32.totalorder %s2162_s29, %s2567_s0  ;;  %p1872_p1 = scmp.lt.u32.totalorder %s1870_s25, %s1865_s28 }
  0x61   : > { %p1868_p11 = pnand %p1867_p9, %p1866_p7  ;;  %p1874_p8 = scmp.lt.u32.totalorder %s1865_s28, %s2162_s29 }
  0x62   : > { %p1873_p4 = por %p1872_p1, %p1871_p2 }
  0x63   : > { %p1869_p13 = pneg %p1868_p11 }
  0x64   : > { %p1875_p12 = por %p1874_p8, %p1873_p4 }
  0x66   : > { %p1876_p6 = pnand %p1875_p12, %p1869_p13 }
  0x68   : > { %1879 = shalt.err (!%p1876_p6)
}
  0x69   : > { %s1880_s14 = scalar_lea.vmem %s2168_s6, 8192  ;;  %s1976_s30 = smov [#allocation2]  }
  0x6a   : > { %p1881_p0 = scmp.ne.s32.totalorder %s2168_s6, %s1880_s14  ;;  %s1885_s24 = sshll.u32 %s1976_s30, 4  ;;  %s1886_s24 = int_to_ptr.vmem [resolvable:$false] %s1885_s24 }
  0x6b   : > { %s1887_s27 = scalar_lea.vmem %s1886_s24, 16384  ;;  %p1888_p11 = scmp.lt.s32.totalorder %s2168_s6, %s1886_s24 }
  0x6c   : > { %p1883_p3 = pnand %p1881_p0, %p1867_p9  ;;  %p1889_p2 = scmp.lt.s32.totalorder %s1887_s27, %s1880_s14 }
  0x6e   : > { %p1884_p7 = pneg %p1883_p3  ;;  %p1890_p1 = por %p1889_p2, %p1888_p11 }
  0x70   : > { %p1891_p4 = pnand %p1890_p1, %p1884_p7 }
  0x72   : > { %1894 = shalt.err (!%p1891_p4)
}
  0x73   : > { %s1977_s5 = smov 128   ;;  %s1978_s28 = smov 8  }
  0x74   : > { %1614 = dma.hbm_to_vmem [thread:$0]  (!%p2164_p10), %s2162_s29, 8192, %s2168_s6, %s2170_s8, %s1977_s5, %s1977_s5, %s1978_s28  }
  0x75   : > { %p2583_p9 = scmp.ne.s32.totalorder %s2577_s23, 0 }
  0x76   : > { %s2201_s9 = sand.u32 (!%p2583_p9), 1, %s1961_s16   ;;  %p2584_p13 = scmp.ne.s32.totalorder (!%p2583_p9), %s2575_s21, 0 }
  0x77   : > { %214 = sbr.rel (%p2583_p9) target bundleno = 554 (0x22a), region = 36  ;;  %s1458_s11 = sshll.u32 (!%p2583_p9), %s2201_s9, 9 }
  0x78   : > { %s217_s25 = scalar_lea.sflag (!%p2583_p9), [#allocation3], %s2201_s9  ;;  %s2207_s26 = scalar_lea.vmem (!%p2583_p9), [#allocation2], %s1458_s11 }
  0x7e   : > { %1940 = dma.done.wait (%p2584_p13), %s217_s25, 8192  }
  0x7f   : > { %1942 = vsyncadd (%p2584_p13), %s217_s25, 4294959104  ;;  %p2585_p10 = scmp.eq.s32.totalorder %s2029_s19, 0 }
  0x81   : > { %1944 = dma.done.wait (%p2585_p10), [#allocation6], 2064   ;;  %p2586_p8 = pmov %p2585_p10 }
  0x83   : > { %1946 = vsyncadd (%p2586_p8), [#allocation6], 4294965232  ;;  %p2587_p12 = pmov %p2586_p8 }
  0x84   : > { %p2588_p6 = pmov %p2586_p8 }
  0x85   : > { %1948 = dma.done.wait (%p2587_p12), [#allocation9], 16  }
  0x86   : > { %1950 = vsyncadd (%p2588_p6), [#allocation9], 4294967280  ;;  %v1979_v0 = vmov 0   ;;  %v1669_v1 = vld [vmem:[#allocation5] sm:$0xff]   ;;  %v1670_v2 = vld [vmem:[#allocation5 + $0x8] sm:$0xff]   ;;  %s2331_s21 = scalar_lea.vmem [#allocation10], %s1458_s11 }
  0x87   : > { %772 = vmatprep.subr.bf16.mxu0 %v1979_v0  ;;  %1553 = vmatprep.subr.bf16.mxu1 %v1979_v0  ;;  %v1671_v3 = vld [vmem:[#allocation5 + $0x10] sm:$0xff]   ;;  %v1672_v4 = vld [vmem:[#allocation5 + $0x18] sm:$0xff]   ;;  %v1673_v5 = vld [vmem:[#allocation5 + $0x20] sm:$0xff]   ;;  %s1552_s23 = sshll.u32 %s2029_s19, 13  ;;  %s1345_s29 = sshll.u32 %s2331_s21, 4  ;;  %s2520_s29 = int_to_ptr.vmem [resolvable:$true] %s1345_s29 }
  0x88   : > { %773 = vmatpush1.bf16.msra.mxu0 %v1669_v1  ;;  %1569 = vmatpush1.bf16.msra.mxu1 %v1669_v1  ;;  %v1687_v6 = vld [vmem:[%s2207_s26 + $0x4] ss:$8 sps:$4 sm:$0xff]   ;;  %v1675_v9 = vld [vmem:[#allocation5 + $0x30] sm:$0xff]   ;;  %v1676_v10 = vld [vmem:[#allocation5 + $0x38] sm:$0xff]   ;;  %s2518_s8 = scalar_lea.hbm %s2571_s4, %s1552_s23  ;;  %s1332_s19 = scalar_lea.sflag [#allocation4], %s2201_s9 }
  0x89   : > { %774 = vmatprep.subr.bf16.mxu0 %v1979_v0  ;;  %1554 = vmatprep.subr.bf16.mxu1 %v1979_v0  ;;  %v1674_v7 = vld [vmem:[#allocation5 + $0x28] sm:$0xff]   ;;  %v1677_v11 = vld [vmem:[#allocation5 + $0x40] sm:$0xff]   ;;  %v1679_v13 = vld [vmem:[#allocation5 + $0x50] sm:$0xff]   ;;  %s1895_s20 = scalar_lea.vmem %s2520_s29, 8192  ;;  %s1980_s14 = smov [#allocation10]  }
  0x8a   : > { %v1690_v8 = vld [vmem:[%s2207_s26 + $0x104] ss:$8 sps:$4 sm:$0xff]   ;;  %804 = vmatprep.mubr.bf16.mxu0 %v1687_v6  ;;  %v1680_v14 = vld [vmem:[#allocation5 + $0x58] sm:$0xff]   ;;  %v1683_v17 = vld [vmem:[#allocation5 + $0x70] sm:$0xff]   ;;  %p1896_p0 = scmp.ne.s32.totalorder %s2520_s29, %s1895_s20  ;;  %s1899_s30 = sshll.u32 %s1980_s14, 4  ;;  %s1900_s30 = int_to_ptr.vmem [resolvable:$false] %s1899_s30 }
  0x8b   : > { %932 = vmatprep.mubr.bf16.mxu1 %v1690_v8  ;;  %v1678_v12 = vld [vmem:[#allocation5 + $0x48] sm:$0xff]   ;;  %v1681_v15 = vld [vmem:[#allocation5 + $0x60] sm:$0xff]   ;;  %v1684_v18 = vld [vmem:[#allocation5 + $0x78] sm:$0xff]   ;;  %s1901_s24 = scalar_lea.vmem %s1900_s30, 16384  ;;  %p1902_p11 = scmp.lt.s32.totalorder %s2520_s29, %s1900_s30 }
  0x8c   : > { %775 = vmatpush1.bf16.msra.mxu0 %v1670_v2  ;;  %1570 = vmatpush1.bf16.msra.mxu1 %v1670_v2  ;;  %v1682_v16 = vld [vmem:[#allocation5 + $0x68] sm:$0xff]   ;;  %v1691_v21 = vld [vmem:[%s2207_s26 + $0x14] ss:$8 sps:$4 sm:$0xff]   ;;  %v1695_v23 = vld [vmem:[%s2207_s26 + $0x10] ss:$8 sps:$4 sm:$0xff]   ;;  %p1897_p3 = pnand %p1896_p0, %p2153_p5  ;;  %p1903_p2 = scmp.lt.s32.totalorder %s1901_s24, %s1895_s20 }
  0x8d   : > { %776 = vmatprep.subr.bf16.mxu0 %v1979_v0  ;;  %1555 = vmatprep.subr.bf16.mxu1 %v1979_v0  ;;  %v1685_v19 = vld [vmem:[%s2207_s26] ss:$8 sps:$4 sm:$0xff]   ;;  %v1693_v22 = vld [vmem:[%s2207_s26 + $0x114] ss:$8 sps:$4 sm:$0xff]   ;;  %v1696_v24 = vld [vmem:[%s2207_s26 + $0x110] ss:$8 sps:$4 sm:$0xff]  }
  0x8e   : > { %v1688_v20 = vld [vmem:[%s2207_s26 + $0x100] ss:$8 sps:$4 sm:$0xff]   ;;  %v1697_v25 = vld [vmem:[%s2207_s26 + $0x24] ss:$8 sps:$4 sm:$0xff]   ;;  %v1703_v29 = vld [vmem:[%s2207_s26 + $0x34] ss:$8 sps:$4 sm:$0xff]   ;;  %p1898_p7 = pneg %p1897_p3  ;;  %p1904_p1 = por %p1903_p2, %p1902_p11 }
  0x8f   : > { %v1699_v26 = vld [vmem:[%s2207_s26 + $0x124] ss:$8 sps:$4 sm:$0xff]   ;;  %v1701_v27 = vld [vmem:[%s2207_s26 + $0x20] ss:$8 sps:$4 sm:$0xff]   ;;  %v1705_v30 = vld [vmem:[%s2207_s26 + $0x134] ss:$8 sps:$4 sm:$0xff]  }
  0x90   : > { %777 = vmatpush1.bf16.msra.mxu0 %v1671_v3  ;;  %1571 = vmatpush1.bf16.msra.mxu1 %v1671_v3  ;;  %v1702_v28 = vld [vmem:[%s2207_s26 + $0x120] ss:$8 sps:$4 sm:$0xff]   ;;  %v1707_v31 = vld [vmem:[%s2207_s26 + $0x30] ss:$8 sps:$4 sm:$0xff]   ;;  %v1709_v33 = vld [vmem:[%s2207_s26 + $0x44] ss:$8 sps:$4 sm:$0xff]   ;;  %p1905_p4 = pnand %p1904_p1, %p1898_p7 }
  0x91   : > { %778 = vmatprep.subr.bf16.mxu0 %v1979_v0  ;;  %1556 = vmatprep.subr.bf16.mxu1 %v1979_v0  ;;  %v1708_v32 = vld [vmem:[%s2207_s26 + $0x130] ss:$8 sps:$4 sm:$0xff]   ;;  %v1711_v34 = vld [vmem:[%s2207_s26 + $0x144] ss:$8 sps:$4 sm:$0xff]   ;;  %v1713_v35 = vld [vmem:[%s2207_s26 + $0x40] ss:$8 sps:$4 sm:$0xff]  }
  0x92   : > { %v1714_v36 = vld [vmem:[%s2207_s26 + $0x140] ss:$8 sps:$4 sm:$0xff]   ;;  %v1715_v37 = vld [vmem:[%s2207_s26 + $0x54] ss:$8 sps:$4 sm:$0xff]   ;;  %v1719_v39 = vld [vmem:[%s2207_s26 + $0x50] ss:$8 sps:$4 sm:$0xff]  }
  0x93   : > { %v1717_v38 = vld [vmem:[%s2207_s26 + $0x154] ss:$8 sps:$4 sm:$0xff]   ;;  %v1720_v40 = vld [vmem:[%s2207_s26 + $0x150] ss:$8 sps:$4 sm:$0xff]   ;;  %v1721_v41 = vld [vmem:[%s2207_s26 + $0x64] ss:$8 sps:$4 sm:$0xff]  }
  0x94   : > { %779 = vmatpush1.bf16.msra.mxu0 %v1672_v4  ;;  %1572 = vmatpush1.bf16.msra.mxu1 %v1672_v4  ;;  %v1723_v42 = vld [vmem:[%s2207_s26 + $0x164] ss:$8 sps:$4 sm:$0xff]   ;;  %v1725_v43 = vld [vmem:[%s2207_s26 + $0x60] ss:$8 sps:$4 sm:$0xff]   ;;  %v1727_v45 = vld [vmem:[%s2207_s26 + $0x74] ss:$8 sps:$4 sm:$0xff]  }
  0x95   : > { %780 = vmatprep.subr.bf16.mxu0 %v1979_v0  ;;  %1557 = vmatprep.subr.bf16.mxu1 %v1979_v0  ;;  %v1726_v44 = vld [vmem:[%s2207_s26 + $0x160] ss:$8 sps:$4 sm:$0xff]   ;;  %v1729_v46 = vld [vmem:[%s2207_s26 + $0x174] ss:$8 sps:$4 sm:$0xff]   ;;  %v1731_v47 = vld [vmem:[%s2207_s26 + $0x70] ss:$8 sps:$4 sm:$0xff]  }
  0x96   : > { %v1732_v48 = vld [vmem:[%s2207_s26 + $0x170] ss:$8 sps:$4 sm:$0xff]   ;;  %v1733_v49 = vld [vmem:[%s2207_s26 + $0x84] ss:$8 sps:$4 sm:$0xff]   ;;  %v1737_v51 = vld [vmem:[%s2207_s26 + $0x80] ss:$8 sps:$4 sm:$0xff]  }
  0x97   : > { %v1735_v50 = vld [vmem:[%s2207_s26 + $0x184] ss:$8 sps:$4 sm:$0xff]   ;;  %v1738_v52 = vld [vmem:[%s2207_s26 + $0x180] ss:$8 sps:$4 sm:$0xff]   ;;  %v1739_v53 = vld [vmem:[%s2207_s26 + $0x94] ss:$8 sps:$4 sm:$0xff]  }
  0x98   : > { %781 = vmatpush1.bf16.msra.mxu0 %v1673_v5  ;;  %1573 = vmatpush1.bf16.msra.mxu1 %v1673_v5  ;;  %v1741_v54 = vld [vmem:[%s2207_s26 + $0x194] ss:$8 sps:$4 sm:$0xff]   ;;  %v1743_v55 = vld [vmem:[%s2207_s26 + $0x90] ss:$8 sps:$4 sm:$0xff]   ;;  %v1745_v57 = vld [vmem:[%s2207_s26 + $0xa4] ss:$8 sps:$4 sm:$0xff]  }
  0x99   : > { %782 = vmatprep.subr.bf16.mxu0 %v1979_v0  ;;  %1558 = vmatprep.subr.bf16.mxu1 %v1979_v0  ;;  %v1744_v56 = vld [vmem:[%s2207_s26 + $0x190] ss:$8 sps:$4 sm:$0xff]   ;;  %v1747_v58 = vld [vmem:[%s2207_s26 + $0x1a4] ss:$8 sps:$4 sm:$0xff]   ;;  %v1749_v59 = vld [vmem:[%s2207_s26 + $0xa0] ss:$8 sps:$4 sm:$0xff]  }
  0x9a   : > { %v1750_v60 = vld [vmem:[%s2207_s26 + $0x1a0] ss:$8 sps:$4 sm:$0xff]   ;;  %v1751_v61 = vld [vmem:[%s2207_s26 + $0xb4] ss:$8 sps:$4 sm:$0xff]   ;;  %v1755_v63 = vld [vmem:[%s2207_s26 + $0xb0] ss:$8 sps:$4 sm:$0xff]  }
  0x9b   : > { %v1753_v62 = vld [vmem:[%s2207_s26 + $0x1b4] ss:$8 sps:$4 sm:$0xff]   ;;  %v1757_v1 = vld [vmem:[%s2207_s26 + $0xc4] ss:$8 sps:$4 sm:$0xff]   ;;  %v1761_v3 = vld [vmem:[%s2207_s26 + $0xc0] ss:$8 sps:$4 sm:$0xff]  }
  0x9c   : > { %783 = vmatpush1.bf16.msra.mxu0 %v1674_v7  ;;  %1574 = vmatpush1.bf16.msra.mxu1 %v1674_v7  ;;  %v1759_v2 = vld [vmem:[%s2207_s26 + $0x1c4] ss:$8 sps:$4 sm:$0xff]   ;;  %v1762_v4 = vld [vmem:[%s2207_s26 + $0x1c0] ss:$8 sps:$4 sm:$0xff]   ;;  %v1763_v5 = vld [vmem:[%s2207_s26 + $0xd4] ss:$8 sps:$4 sm:$0xff]  }
  0x9d   : > { %784 = vmatprep.subr.bf16.mxu0 %v1979_v0  ;;  %1559 = vmatprep.subr.bf16.mxu1 %v1979_v0  ;;  %v1765_v6 = vld [vmem:[%s2207_s26 + $0x1d4] ss:$8 sps:$4 sm:$0xff]   ;;  %v1767_v7 = vld [vmem:[%s2207_s26 + $0xd0] ss:$8 sps:$4 sm:$0xff]  }
  0x9e   : > { %v1768_v8 = vld [vmem:[%s2207_s26 + $0x1d0] ss:$8 sps:$4 sm:$0xff]  }
  0xa0   : > { %785 = vmatpush1.bf16.msra.mxu0 %v1675_v9  ;;  %1575 = vmatpush1.bf16.msra.mxu1 %v1675_v9  ;;  %v1769_v9 = vld [vmem:[%s2207_s26 + $0xe4] ss:$8 sps:$4 sm:$0xff]  }
  0xa1   : > { %786 = vmatprep.subr.bf16.mxu0 %v1979_v0  ;;  %1560 = vmatprep.subr.bf16.mxu1 %v1979_v0 }
  0xa4   : > { %787 = vmatpush1.bf16.msra.mxu0 %v1676_v10  ;;  %1576 = vmatpush1.bf16.msra.mxu1 %v1676_v10  ;;  %v1771_v10 = vld [vmem:[%s2207_s26 + $0x1e4] ss:$8 sps:$4 sm:$0xff]  }
  0xa5   : > { %788 = vmatprep.subr.bf16.mxu0 %v1979_v0  ;;  %1561 = vmatprep.subr.bf16.mxu1 %v1979_v0 }
  0xa8   : > { %789 = vmatpush1.bf16.msra.mxu0 %v1677_v11  ;;  %1577 = vmatpush1.bf16.msra.mxu1 %v1677_v11  ;;  %v1773_v11 = vld [vmem:[%s2207_s26 + $0xe0] ss:$8 sps:$4 sm:$0xff]  }
  0xa9   : > { %790 = vmatprep.subr.bf16.mxu0 %v1979_v0  ;;  %1562 = vmatprep.subr.bf16.mxu1 %v1979_v0 }
  0xac   : > { %791 = vmatpush1.bf16.msra.mxu0 %v1678_v12  ;;  %1578 = vmatpush1.bf16.msra.mxu1 %v1678_v12  ;;  %v1774_v12 = vld [vmem:[%s2207_s26 + $0x1e0] ss:$8 sps:$4 sm:$0xff]  }
  0xad   : > { %792 = vmatprep.subr.bf16.mxu0 %v1979_v0  ;;  %1563 = vmatprep.subr.bf16.mxu1 %v1979_v0 }
  0xb0   : > { %793 = vmatpush1.bf16.msra.mxu0 %v1679_v13  ;;  %1579 = vmatpush1.bf16.msra.mxu1 %v1679_v13  ;;  %v1775_v13 = vld [vmem:[%s2207_s26 + $0xf4] ss:$8 sps:$4 sm:$0xff]  }
  0xb1   : > { %794 = vmatprep.subr.bf16.mxu0 %v1979_v0  ;;  %1564 = vmatprep.subr.bf16.mxu1 %v1979_v0 }
  0xb4   : > { %795 = vmatpush1.bf16.msra.mxu0 %v1680_v14  ;;  %1580 = vmatpush1.bf16.msra.mxu1 %v1680_v14  ;;  %v1777_v14 = vld [vmem:[%s2207_s26 + $0x1f4] ss:$8 sps:$4 sm:$0xff]  }
  0xb5   : > { %796 = vmatprep.subr.bf16.mxu0 %v1979_v0  ;;  %1565 = vmatprep.subr.bf16.mxu1 %v1979_v0 }
  0xb8   : > { %797 = vmatpush1.bf16.msra.mxu0 %v1681_v15  ;;  %1581 = vmatpush1.bf16.msra.mxu1 %v1681_v15  ;;  %v1779_v15 = vld [vmem:[%s2207_s26 + $0xf0] ss:$8 sps:$4 sm:$0xff]  }
  0xb9   : > { %798 = vmatprep.subr.bf16.mxu0 %v1979_v0  ;;  %1566 = vmatprep.subr.bf16.mxu1 %v1979_v0 }
  0xbc   : > { %799 = vmatpush1.bf16.msra.mxu0 %v1682_v16  ;;  %1582 = vmatpush1.bf16.msra.mxu1 %v1682_v16  ;;  %v1780_v16 = vld [vmem:[%s2207_s26 + $0x1f0] ss:$8 sps:$4 sm:$0xff]  }
  0xbd   : > { %800 = vmatprep.subr.bf16.mxu0 %v1979_v0  ;;  %1567 = vmatprep.subr.bf16.mxu1 %v1979_v0 }
  0xc0   : > { %801 = vmatpush1.bf16.msra.mxu0 %v1683_v17  ;;  %1583 = vmatpush1.bf16.msra.mxu1 %v1683_v17  ;;  %v2317_v17 = vld [vmem:[#allocation7] ss:$0 sm:$0xff] }
  0xc1   : > { %802 = vmatprep.subr.bf16.mxu0 %v1979_v0  ;;  %1568 = vmatprep.subr.bf16.mxu1 %v1979_v0  ;;  %v1756_v0 = vld [vmem:[%s2207_s26 + $0x1b0] ss:$8 sps:$4 sm:$0xff]  }
  0xc4   : > { %803 = vmatpush1.bf16.msra.mxu0 %v1684_v18  ;;  %1584 = vmatpush1.bf16.msra.mxu1 %v1684_v18 }
  0xc7   : > { %805 = vmatmul.mubr.bf16.vlgmr.msra.gmra.mrb[0].mxu0 %v1685_v19  ;;  %933 = vmatmul.mubr.bf16.vlgmr.msra.gmra.mrb[0].mxu1 %v1688_v20  ;;  %v2319_v19 = vld [vmem:[#allocation8] ss:$0 sm:$0xff] }
  0xc8   : > { %812 = vmatprep.mubr.bf16.mxu0 %v1691_v21  ;;  %940 = vmatprep.mubr.bf16.mxu1 %v1693_v22 }
  0xcf   : > { %813 = vmatmul.mubr.bf16.gmra.mrb[4].mxu0 %v1695_v23  ;;  %941 = vmatmul.mubr.bf16.gmra.mrb[4].mxu1 %v1696_v24 }
  0xd0   : > { %820 = vmatprep.mubr.bf16.mxu0 %v1697_v25  ;;  %948 = vmatprep.mubr.bf16.mxu1 %v1699_v26 }
  0xd7   : > { %821 = vmatmul.mubr.bf16.gmra.mrb[8].mxu0 %v1701_v27  ;;  %949 = vmatmul.mubr.bf16.gmra.mrb[8].mxu1 %v1702_v28 }
  0xd8   : > { %828 = vmatprep.mubr.bf16.mxu0 %v1703_v29  ;;  %956 = vmatprep.mubr.bf16.mxu1 %v1705_v30 }
  0xdf   : > { %829 = vmatmul.mubr.bf16.gmra.mrb[12].mxu0 %v1707_v31  ;;  %957 = vmatmul.mubr.bf16.gmra.mrb[12].mxu1 %v1708_v32 }
  0xe0   : > { %836 = vmatprep.mubr.bf16.mxu0 %v1709_v33  ;;  %964 = vmatprep.mubr.bf16.mxu1 %v1711_v34 }
  0xe7   : > { %837 = vmatmul.mubr.bf16.gmra.mrb[16].mxu0 %v1713_v35  ;;  %965 = vmatmul.mubr.bf16.gmra.mrb[16].mxu1 %v1714_v36 }
  0xe8   : > { %844 = vmatprep.mubr.bf16.mxu0 %v1715_v37  ;;  %972 = vmatprep.mubr.bf16.mxu1 %v1717_v38 }
  0xef   : > { %845 = vmatmul.mubr.bf16.gmra.mrb[20].mxu0 %v1719_v39  ;;  %973 = vmatmul.mubr.bf16.gmra.mrb[20].mxu1 %v1720_v40 }
  0xf0   : > { %852 = vmatprep.mubr.bf16.mxu0 %v1721_v41  ;;  %980 = vmatprep.mubr.bf16.mxu1 %v1723_v42 }
  0xf7   : > { %853 = vmatmul.mubr.bf16.gmra.mrb[24].mxu0 %v1725_v43  ;;  %981 = vmatmul.mubr.bf16.gmra.mrb[24].mxu1 %v1726_v44 }
  0xf8   : > { %860 = vmatprep.mubr.bf16.mxu0 %v1727_v45  ;;  %988 = vmatprep.mubr.bf16.mxu1 %v1729_v46 }
  0xff   : > { %861 = vmatmul.mubr.bf16.gmra.mrb[28].mxu0 %v1731_v47  ;;  %989 = vmatmul.mubr.bf16.gmra.mrb[28].mxu1 %v1732_v48 }
 0x100   : > { %868 = vmatprep.mubr.bf16.mxu0 %v1733_v49  ;;  %996 = vmatprep.mubr.bf16.mxu1 %v1735_v50 }
 0x107   : > { %869 = vmatmul.mubr.bf16.gmra.mrb[32].mxu0 %v1737_v51  ;;  %997 = vmatmul.mubr.bf16.gmra.mrb[32].mxu1 %v1738_v52 }
 0x108   : > { %876 = vmatprep.mubr.bf16.mxu0 %v1739_v53  ;;  %1004 = vmatprep.mubr.bf16.mxu1 %v1741_v54 }
 0x10f   : > { %877 = vmatmul.mubr.bf16.gmra.mrb[36].mxu0 %v1743_v55  ;;  %1005 = vmatmul.mubr.bf16.gmra.mrb[36].mxu1 %v1744_v56 }
 0x110   : > { %884 = vmatprep.mubr.bf16.mxu0 %v1745_v57  ;;  %1012 = vmatprep.mubr.bf16.mxu1 %v1747_v58 }
 0x117   : > { %885 = vmatmul.mubr.bf16.gmra.mrb[40].mxu0 %v1749_v59  ;;  %1013 = vmatmul.mubr.bf16.gmra.mrb[40].mxu1 %v1750_v60 }
 0x118   : > { %892 = vmatprep.mubr.bf16.mxu0 %v1751_v61  ;;  %1020 = vmatprep.mubr.bf16.mxu1 %v1753_v62 }
 0x11f   : > { %893 = vmatmul.mubr.bf16.gmra.mrb[44].mxu0 %v1755_v63  ;;  %1021 = vmatmul.mubr.bf16.gmra.mrb[44].mxu1 %v1756_v0 }
 0x120   : > { %900 = vmatprep.mubr.bf16.mxu0 %v1757_v1  ;;  %1028 = vmatprep.mubr.bf16.mxu1 %v1759_v2 }
 0x127   : > { %901 = vmatmul.mubr.bf16.gmra.mrb[48].mxu0 %v1761_v3  ;;  %1029 = vmatmul.mubr.bf16.gmra.mrb[48].mxu1 %v1762_v4 }
 0x128   : > { %908 = vmatprep.mubr.bf16.mxu0 %v1763_v5  ;;  %1036 = vmatprep.mubr.bf16.mxu1 %v1765_v6 }
 0x12f   : > { %909 = vmatmul.mubr.bf16.gmra.mrb[52].mxu0 %v1767_v7  ;;  %1037 = vmatmul.mubr.bf16.gmra.mrb[52].mxu1 %v1768_v8 }
 0x130   : > { %916 = vmatprep.mubr.bf16.mxu0 %v1769_v9  ;;  %1044 = vmatprep.mubr.bf16.mxu1 %v1771_v10 }
 0x137   : > { %917 = vmatmul.mubr.bf16.gmra.mrb[56].mxu0 %v1773_v11  ;;  %1045 = vmatmul.mubr.bf16.gmra.mrb[56].mxu1 %v1774_v12 }
 0x138   : > { %924 = vmatprep.mubr.bf16.mxu0 %v1775_v13  ;;  %1052 = vmatprep.mubr.bf16.mxu1 %v1777_v14 }
 0x13f   : > { %925 = vmatmul.mubr.bf16.gmra.mrb[60].mxu0 %v1779_v15  ;;  %1053 = vmatmul.mubr.bf16.gmra.mrb[60].mxu1 %v1780_v16 }
 0x19a   : > { %v806_v18 = vpop.f32.mrb[0].mxu0  ;;  %v934_v20 = vpop.f32.mrb[0].mxu1 }
 0x19b   : > { %v1068_v21 = vmul.f32 %v2317_v17, %v806_v18  ;;  %v1100_v22 = vmul.f32 %v2317_v17, %v934_v20  ;;  %v808_v23 = vpop.f32.mrb[1].mxu0  ;;  %v936_v24 = vpop.f32.mrb[1].mxu1 }
 0x19c   : > { %v809_v25 = vpop.f32.mrb[2].mxu0  ;;  %v937_v26 = vpop.f32.mrb[2].mxu1 }
 0x19d   : > { %v1139_v27 = vadd.f32 %v2319_v19, %v1068_v21  ;;  %v1171_v28 = vadd.f32 %v2319_v19, %v1100_v22  ;;  %v1069_v29 = vmul.f32 %v2317_v17, %v809_v25  ;;  %v1101_v30 = vmul.f32 %v2317_v17, %v937_v26  ;;  %v811_v31 = vpop.f32.mrb[3].mxu0  ;;  %v939_v32 = vpop.f32.mrb[3].mxu1 }
 0x19f   : > { %v1203_v33 = vmax.f32 %v1139_v27, 0.0  ;;  %v1235_v34 = vmax.f32 %v1171_v28, 0.0  ;;  %v1140_v35 = vadd.f32 %v2319_v19, %v1069_v29  ;;  %v1172_v36 = vadd.f32 %v2319_v19, %v1101_v30 }
 0x1a1   : > { %1267 = vst [vmem:[%s2331_s21] sm:$0xff] %v1203_v33  ;;  %1299 = vst [vmem:[%s2331_s21 + $0x100] sm:$0xff] %v1235_v34  ;;  %v1204_v37 = vmax.f32 %v1140_v35, 0.0  ;;  %v1236_v38 = vmax.f32 %v1172_v36, 0.0 }
 0x1a2   : > { %v814_v39 = vpop.f32.mrb[4].mxu0  ;;  %v942_v40 = vpop.f32.mrb[4].mxu1 }
 0x1a3   : > { %1268 = vst [vmem:[%s2331_s21 + $0x8] sm:$0xff] %v1204_v37  ;;  %1300 = vst [vmem:[%s2331_s21 + $0x108] sm:$0xff] %v1236_v38  ;;  %v1070_v41 = vmul.f32 %v2317_v17, %v814_v39  ;;  %v1102_v42 = vmul.f32 %v2317_v17, %v942_v40  ;;  %v816_v43 = vpop.f32.mrb[5].mxu0  ;;  %v944_v44 = vpop.f32.mrb[5].mxu1 }
 0x1a4   : > { %v817_v45 = vpop.f32.mrb[6].mxu0  ;;  %v945_v46 = vpop.f32.mrb[6].mxu1 }
 0x1a5   : > { %v1141_v47 = vadd.f32 %v2319_v19, %v1070_v41  ;;  %v1173_v48 = vadd.f32 %v2319_v19, %v1102_v42  ;;  %v1071_v49 = vmul.f32 %v2317_v17, %v817_v45  ;;  %v1103_v50 = vmul.f32 %v2317_v17, %v945_v46  ;;  %v819_v51 = vpop.f32.mrb[7].mxu0  ;;  %v947_v52 = vpop.f32.mrb[7].mxu1 }
 0x1a7   : > { %v1205_v53 = vmax.f32 %v1141_v47, 0.0  ;;  %v1237_v54 = vmax.f32 %v1173_v48, 0.0  ;;  %v1142_v55 = vadd.f32 %v2319_v19, %v1071_v49  ;;  %v1174_v56 = vadd.f32 %v2319_v19, %v1103_v50 }
 0x1a9   : > { %1269 = vst [vmem:[%s2331_s21 + $0x10] sm:$0xff] %v1205_v53  ;;  %1301 = vst [vmem:[%s2331_s21 + $0x110] sm:$0xff] %v1237_v54  ;;  %v1206_v57 = vmax.f32 %v1142_v55, 0.0  ;;  %v1238_v58 = vmax.f32 %v1174_v56, 0.0 }
 0x1aa   : > { %v822_v59 = vpop.f32.mrb[8].mxu0  ;;  %v950_v60 = vpop.f32.mrb[8].mxu1 }
 0x1ab   : > { %1270 = vst [vmem:[%s2331_s21 + $0x18] sm:$0xff] %v1206_v57  ;;  %1302 = vst [vmem:[%s2331_s21 + $0x118] sm:$0xff] %v1238_v58  ;;  %v1072_v61 = vmul.f32 %v2317_v17, %v822_v59  ;;  %v1104_v62 = vmul.f32 %v2317_v17, %v950_v60  ;;  %v824_v63 = vpop.f32.mrb[9].mxu0  ;;  %v952_v0 = vpop.f32.mrb[9].mxu1 }
 0x1ac   : > { %v825_v1 = vpop.f32.mrb[10].mxu0  ;;  %v953_v2 = vpop.f32.mrb[10].mxu1 }
 0x1ad   : > { %v1143_v3 = vadd.f32 %v2319_v19, %v1072_v61  ;;  %v1175_v4 = vadd.f32 %v2319_v19, %v1104_v62  ;;  %v1073_v5 = vmul.f32 %v2317_v17, %v825_v1  ;;  %v1105_v6 = vmul.f32 %v2317_v17, %v953_v2  ;;  %v827_v7 = vpop.f32.mrb[11].mxu0  ;;  %v955_v8 = vpop.f32.mrb[11].mxu1 }
 0x1af   : > { %v1207_v9 = vmax.f32 %v1143_v3, 0.0  ;;  %v1239_v10 = vmax.f32 %v1175_v4, 0.0  ;;  %v1144_v11 = vadd.f32 %v2319_v19, %v1073_v5  ;;  %v1176_v12 = vadd.f32 %v2319_v19, %v1105_v6 }
 0x1b1   : > { %1271 = vst [vmem:[%s2331_s21 + $0x20] sm:$0xff] %v1207_v9  ;;  %1303 = vst [vmem:[%s2331_s21 + $0x120] sm:$0xff] %v1239_v10  ;;  %v1208_v13 = vmax.f32 %v1144_v11, 0.0  ;;  %v1240_v14 = vmax.f32 %v1176_v12, 0.0 }
 0x1b2   : > { %v830_v15 = vpop.f32.mrb[12].mxu0  ;;  %v958_v16 = vpop.f32.mrb[12].mxu1 }
 0x1b3   : > { %1272 = vst [vmem:[%s2331_s21 + $0x28] sm:$0xff] %v1208_v13  ;;  %1304 = vst [vmem:[%s2331_s21 + $0x128] sm:$0xff] %v1240_v14  ;;  %v1074_v18 = vmul.f32 %v2317_v17, %v830_v15  ;;  %v1106_v20 = vmul.f32 %v2317_v17, %v958_v16  ;;  %v832_v21 = vpop.f32.mrb[13].mxu0  ;;  %v960_v22 = vpop.f32.mrb[13].mxu1 }
 0x1b4   : > { %v833_v23 = vpop.f32.mrb[14].mxu0  ;;  %v961_v24 = vpop.f32.mrb[14].mxu1 }
 0x1b5   : > { %v1145_v25 = vadd.f32 %v2319_v19, %v1074_v18  ;;  %v1177_v26 = vadd.f32 %v2319_v19, %v1106_v20  ;;  %v1075_v27 = vmul.f32 %v2317_v17, %v833_v23  ;;  %v1107_v28 = vmul.f32 %v2317_v17, %v961_v24  ;;  %v835_v29 = vpop.f32.mrb[15].mxu0  ;;  %v963_v30 = vpop.f32.mrb[15].mxu1 }
 0x1b7   : > { %v1209_v31 = vmax.f32 %v1145_v25, 0.0  ;;  %v1241_v32 = vmax.f32 %v1177_v26, 0.0  ;;  %v1146_v33 = vadd.f32 %v2319_v19, %v1075_v27  ;;  %v1178_v34 = vadd.f32 %v2319_v19, %v1107_v28 }
 0x1b9   : > { %1273 = vst [vmem:[%s2331_s21 + $0x30] sm:$0xff] %v1209_v31  ;;  %1305 = vst [vmem:[%s2331_s21 + $0x130] sm:$0xff] %v1241_v32  ;;  %v1210_v35 = vmax.f32 %v1146_v33, 0.0  ;;  %v1242_v36 = vmax.f32 %v1178_v34, 0.0 }
 0x1ba   : > { %v838_v37 = vpop.f32.mrb[16].mxu0  ;;  %v966_v38 = vpop.f32.mrb[16].mxu1 }
 0x1bb   : > { %1274 = vst [vmem:[%s2331_s21 + $0x38] sm:$0xff] %v1210_v35  ;;  %1306 = vst [vmem:[%s2331_s21 + $0x138] sm:$0xff] %v1242_v36  ;;  %v1076_v39 = vmul.f32 %v2317_v17, %v838_v37  ;;  %v1108_v40 = vmul.f32 %v2317_v17, %v966_v38  ;;  %v840_v41 = vpop.f32.mrb[17].mxu0  ;;  %v968_v42 = vpop.f32.mrb[17].mxu1 }
 0x1bc   : > { %v841_v43 = vpop.f32.mrb[18].mxu0  ;;  %v969_v44 = vpop.f32.mrb[18].mxu1 }
 0x1bd   : > { %v1147_v45 = vadd.f32 %v2319_v19, %v1076_v39  ;;  %v1179_v46 = vadd.f32 %v2319_v19, %v1108_v40  ;;  %v1077_v47 = vmul.f32 %v2317_v17, %v841_v43  ;;  %v1109_v48 = vmul.f32 %v2317_v17, %v969_v44  ;;  %v843_v49 = vpop.f32.mrb[19].mxu0  ;;  %v971_v50 = vpop.f32.mrb[19].mxu1 }
 0x1bf   : > { %v1211_v51 = vmax.f32 %v1147_v45, 0.0  ;;  %v1243_v52 = vmax.f32 %v1179_v46, 0.0  ;;  %v1148_v53 = vadd.f32 %v2319_v19, %v1077_v47  ;;  %v1180_v54 = vadd.f32 %v2319_v19, %v1109_v48 }
 0x1c1   : > { %1275 = vst [vmem:[%s2331_s21 + $0x40] sm:$0xff] %v1211_v51  ;;  %1307 = vst [vmem:[%s2331_s21 + $0x140] sm:$0xff] %v1243_v52  ;;  %v1212_v55 = vmax.f32 %v1148_v53, 0.0  ;;  %v1244_v56 = vmax.f32 %v1180_v54, 0.0 }
 0x1c2   : > { %v846_v57 = vpop.f32.mrb[20].mxu0  ;;  %v974_v58 = vpop.f32.mrb[20].mxu1 }
 0x1c3   : > { %1276 = vst [vmem:[%s2331_s21 + $0x48] sm:$0xff] %v1212_v55  ;;  %1308 = vst [vmem:[%s2331_s21 + $0x148] sm:$0xff] %v1244_v56  ;;  %v1078_v59 = vmul.f32 %v2317_v17, %v846_v57  ;;  %v1110_v60 = vmul.f32 %v2317_v17, %v974_v58  ;;  %v848_v61 = vpop.f32.mrb[21].mxu0  ;;  %v976_v62 = vpop.f32.mrb[21].mxu1 }
 0x1c4   : > { %v849_v63 = vpop.f32.mrb[22].mxu0  ;;  %v977_v0 = vpop.f32.mrb[22].mxu1 }
 0x1c5   : > { %v1149_v1 = vadd.f32 %v2319_v19, %v1078_v59  ;;  %v1181_v2 = vadd.f32 %v2319_v19, %v1110_v60  ;;  %v1079_v3 = vmul.f32 %v2317_v17, %v849_v63  ;;  %v1111_v4 = vmul.f32 %v2317_v17, %v977_v0  ;;  %v851_v5 = vpop.f32.mrb[23].mxu0  ;;  %v979_v6 = vpop.f32.mrb[23].mxu1 }
 0x1c7   : > { %v1213_v7 = vmax.f32 %v1149_v1, 0.0  ;;  %v1245_v8 = vmax.f32 %v1181_v2, 0.0  ;;  %v1150_v9 = vadd.f32 %v2319_v19, %v1079_v3  ;;  %v1182_v10 = vadd.f32 %v2319_v19, %v1111_v4 }
 0x1c9   : > { %1277 = vst [vmem:[%s2331_s21 + $0x50] sm:$0xff] %v1213_v7  ;;  %1309 = vst [vmem:[%s2331_s21 + $0x150] sm:$0xff] %v1245_v8  ;;  %v1214_v11 = vmax.f32 %v1150_v9, 0.0  ;;  %v1246_v12 = vmax.f32 %v1182_v10, 0.0 }
 0x1ca   : > { %v854_v13 = vpop.f32.mrb[24].mxu0  ;;  %v982_v14 = vpop.f32.mrb[24].mxu1 }
 0x1cb   : > { %1278 = vst [vmem:[%s2331_s21 + $0x58] sm:$0xff] %v1214_v11  ;;  %1310 = vst [vmem:[%s2331_s21 + $0x158] sm:$0xff] %v1246_v12  ;;  %v1080_v15 = vmul.f32 %v2317_v17, %v854_v13  ;;  %v1112_v16 = vmul.f32 %v2317_v17, %v982_v14  ;;  %v856_v18 = vpop.f32.mrb[25].mxu0  ;;  %v984_v20 = vpop.f32.mrb[25].mxu1 }
 0x1cc   : > { %v857_v21 = vpop.f32.mrb[26].mxu0  ;;  %v985_v22 = vpop.f32.mrb[26].mxu1 }
 0x1cd   : > { %v1151_v23 = vadd.f32 %v2319_v19, %v1080_v15  ;;  %v1183_v24 = vadd.f32 %v2319_v19, %v1112_v16  ;;  %v1081_v25 = vmul.f32 %v2317_v17, %v857_v21  ;;  %v1113_v26 = vmul.f32 %v2317_v17, %v985_v22  ;;  %v859_v27 = vpop.f32.mrb[27].mxu0  ;;  %v987_v28 = vpop.f32.mrb[27].mxu1 }
 0x1cf   : > { %v1215_v29 = vmax.f32 %v1151_v23, 0.0  ;;  %v1247_v30 = vmax.f32 %v1183_v24, 0.0  ;;  %v1152_v31 = vadd.f32 %v2319_v19, %v1081_v25  ;;  %v1184_v32 = vadd.f32 %v2319_v19, %v1113_v26 }
 0x1d1   : > { %1279 = vst [vmem:[%s2331_s21 + $0x60] sm:$0xff] %v1215_v29  ;;  %1311 = vst [vmem:[%s2331_s21 + $0x160] sm:$0xff] %v1247_v30  ;;  %v1216_v33 = vmax.f32 %v1152_v31, 0.0  ;;  %v1248_v34 = vmax.f32 %v1184_v32, 0.0 }
 0x1d2   : > { %v862_v35 = vpop.f32.mrb[28].mxu0  ;;  %v990_v36 = vpop.f32.mrb[28].mxu1 }
 0x1d3   : > { %1280 = vst [vmem:[%s2331_s21 + $0x68] sm:$0xff] %v1216_v33  ;;  %1312 = vst [vmem:[%s2331_s21 + $0x168] sm:$0xff] %v1248_v34  ;;  %v1082_v37 = vmul.f32 %v2317_v17, %v862_v35  ;;  %v1114_v38 = vmul.f32 %v2317_v17, %v990_v36  ;;  %v864_v39 = vpop.f32.mrb[29].mxu0  ;;  %v992_v40 = vpop.f32.mrb[29].mxu1 }
 0x1d4   : > { %v865_v41 = vpop.f32.mrb[30].mxu0  ;;  %v993_v42 = vpop.f32.mrb[30].mxu1 }
 0x1d5   : > { %v1153_v43 = vadd.f32 %v2319_v19, %v1082_v37  ;;  %v1185_v44 = vadd.f32 %v2319_v19, %v1114_v38  ;;  %v1083_v45 = vmul.f32 %v2317_v17, %v865_v41  ;;  %v1115_v46 = vmul.f32 %v2317_v17, %v993_v42  ;;  %v867_v47 = vpop.f32.mrb[31].mxu0  ;;  %v995_v48 = vpop.f32.mrb[31].mxu1 }
 0x1d7   : > { %v1217_v49 = vmax.f32 %v1153_v43, 0.0  ;;  %v1249_v50 = vmax.f32 %v1185_v44, 0.0  ;;  %v1154_v51 = vadd.f32 %v2319_v19, %v1083_v45  ;;  %v1186_v52 = vadd.f32 %v2319_v19, %v1115_v46 }
 0x1d9   : > { %1281 = vst [vmem:[%s2331_s21 + $0x70] sm:$0xff] %v1217_v49  ;;  %1313 = vst [vmem:[%s2331_s21 + $0x170] sm:$0xff] %v1249_v50  ;;  %v1218_v53 = vmax.f32 %v1154_v51, 0.0  ;;  %v1250_v54 = vmax.f32 %v1186_v52, 0.0 }
 0x1da   : > { %v870_v55 = vpop.f32.mrb[32].mxu0  ;;  %v998_v56 = vpop.f32.mrb[32].mxu1 }
 0x1db   : > { %1282 = vst [vmem:[%s2331_s21 + $0x78] sm:$0xff] %v1218_v53  ;;  %1314 = vst [vmem:[%s2331_s21 + $0x178] sm:$0xff] %v1250_v54  ;;  %v1084_v57 = vmul.f32 %v2317_v17, %v870_v55  ;;  %v1116_v58 = vmul.f32 %v2317_v17, %v998_v56  ;;  %v872_v59 = vpop.f32.mrb[33].mxu0  ;;  %v1000_v60 = vpop.f32.mrb[33].mxu1 }
 0x1dc   : > { %v873_v61 = vpop.f32.mrb[34].mxu0  ;;  %v1001_v62 = vpop.f32.mrb[34].mxu1 }
 0x1dd   : > { %v1155_v63 = vadd.f32 %v2319_v19, %v1084_v57  ;;  %v1187_v0 = vadd.f32 %v2319_v19, %v1116_v58  ;;  %v1085_v1 = vmul.f32 %v2317_v17, %v873_v61  ;;  %v1117_v2 = vmul.f32 %v2317_v17, %v1001_v62  ;;  %v875_v3 = vpop.f32.mrb[35].mxu0  ;;  %v1003_v4 = vpop.f32.mrb[35].mxu1 }
 0x1df   : > { %v1219_v5 = vmax.f32 %v1155_v63, 0.0  ;;  %v1251_v6 = vmax.f32 %v1187_v0, 0.0  ;;  %v1156_v7 = vadd.f32 %v2319_v19, %v1085_v1  ;;  %v1188_v8 = vadd.f32 %v2319_v19, %v1117_v2 }
 0x1e1   : > { %1283 = vst [vmem:[%s2331_s21 + $0x80] sm:$0xff] %v1219_v5  ;;  %1315 = vst [vmem:[%s2331_s21 + $0x180] sm:$0xff] %v1251_v6  ;;  %v1220_v9 = vmax.f32 %v1156_v7, 0.0  ;;  %v1252_v10 = vmax.f32 %v1188_v8, 0.0 }
 0x1e2   : > { %v878_v11 = vpop.f32.mrb[36].mxu0  ;;  %v1006_v12 = vpop.f32.mrb[36].mxu1 }
 0x1e3   : > { %1284 = vst [vmem:[%s2331_s21 + $0x88] sm:$0xff] %v1220_v9  ;;  %1316 = vst [vmem:[%s2331_s21 + $0x188] sm:$0xff] %v1252_v10  ;;  %v1086_v13 = vmul.f32 %v2317_v17, %v878_v11  ;;  %v1118_v14 = vmul.f32 %v2317_v17, %v1006_v12  ;;  %v880_v15 = vpop.f32.mrb[37].mxu0  ;;  %v1008_v16 = vpop.f32.mrb[37].mxu1 }
 0x1e4   : > { %v881_v18 = vpop.f32.mrb[38].mxu0  ;;  %v1009_v20 = vpop.f32.mrb[38].mxu1 }
 0x1e5   : > { %v1157_v21 = vadd.f32 %v2319_v19, %v1086_v13  ;;  %v1189_v22 = vadd.f32 %v2319_v19, %v1118_v14  ;;  %v1087_v23 = vmul.f32 %v2317_v17, %v881_v18  ;;  %v1119_v24 = vmul.f32 %v2317_v17, %v1009_v20  ;;  %v883_v25 = vpop.f32.mrb[39].mxu0  ;;  %v1011_v26 = vpop.f32.mrb[39].mxu1 }
 0x1e7   : > { %v1221_v27 = vmax.f32 %v1157_v21, 0.0  ;;  %v1253_v28 = vmax.f32 %v1189_v22, 0.0  ;;  %v1158_v29 = vadd.f32 %v2319_v19, %v1087_v23  ;;  %v1190_v30 = vadd.f32 %v2319_v19, %v1119_v24 }
 0x1e9   : > { %1285 = vst [vmem:[%s2331_s21 + $0x90] sm:$0xff] %v1221_v27  ;;  %1317 = vst [vmem:[%s2331_s21 + $0x190] sm:$0xff] %v1253_v28  ;;  %v1222_v31 = vmax.f32 %v1158_v29, 0.0  ;;  %v1254_v32 = vmax.f32 %v1190_v30, 0.0 }
 0x1ea   : > { %v886_v33 = vpop.f32.mrb[40].mxu0  ;;  %v1014_v34 = vpop.f32.mrb[40].mxu1 }
 0x1eb   : > { %1286 = vst [vmem:[%s2331_s21 + $0x98] sm:$0xff] %v1222_v31  ;;  %1318 = vst [vmem:[%s2331_s21 + $0x198] sm:$0xff] %v1254_v32  ;;  %v1088_v35 = vmul.f32 %v2317_v17, %v886_v33  ;;  %v1120_v36 = vmul.f32 %v2317_v17, %v1014_v34  ;;  %v888_v37 = vpop.f32.mrb[41].mxu0  ;;  %v1016_v38 = vpop.f32.mrb[41].mxu1 }
 0x1ec   : > { %v889_v39 = vpop.f32.mrb[42].mxu0  ;;  %v1017_v40 = vpop.f32.mrb[42].mxu1 }
 0x1ed   : > { %v1159_v41 = vadd.f32 %v2319_v19, %v1088_v35  ;;  %v1191_v42 = vadd.f32 %v2319_v19, %v1120_v36  ;;  %v1089_v43 = vmul.f32 %v2317_v17, %v889_v39  ;;  %v1121_v44 = vmul.f32 %v2317_v17, %v1017_v40  ;;  %v891_v45 = vpop.f32.mrb[43].mxu0  ;;  %v1019_v46 = vpop.f32.mrb[43].mxu1 }
 0x1ef   : > { %v1223_v47 = vmax.f32 %v1159_v41, 0.0  ;;  %v1255_v48 = vmax.f32 %v1191_v42, 0.0  ;;  %v1160_v49 = vadd.f32 %v2319_v19, %v1089_v43  ;;  %v1192_v50 = vadd.f32 %v2319_v19, %v1121_v44 }
 0x1f1   : > { %1287 = vst [vmem:[%s2331_s21 + $0xa0] sm:$0xff] %v1223_v47  ;;  %1319 = vst [vmem:[%s2331_s21 + $0x1a0] sm:$0xff] %v1255_v48  ;;  %v1224_v51 = vmax.f32 %v1160_v49, 0.0  ;;  %v1256_v52 = vmax.f32 %v1192_v50, 0.0 }
 0x1f2   : > { %v894_v53 = vpop.f32.mrb[44].mxu0  ;;  %v1022_v54 = vpop.f32.mrb[44].mxu1 }
 0x1f3   : > { %1288 = vst [vmem:[%s2331_s21 + $0xa8] sm:$0xff] %v1224_v51  ;;  %1320 = vst [vmem:[%s2331_s21 + $0x1a8] sm:$0xff] %v1256_v52  ;;  %v1090_v55 = vmul.f32 %v2317_v17, %v894_v53  ;;  %v1122_v56 = vmul.f32 %v2317_v17, %v1022_v54  ;;  %v896_v57 = vpop.f32.mrb[45].mxu0  ;;  %v1024_v58 = vpop.f32.mrb[45].mxu1 }
 0x1f4   : > { %v897_v59 = vpop.f32.mrb[46].mxu0  ;;  %v1025_v60 = vpop.f32.mrb[46].mxu1 }
 0x1f5   : > { %v1161_v61 = vadd.f32 %v2319_v19, %v1090_v55  ;;  %v1193_v62 = vadd.f32 %v2319_v19, %v1122_v56  ;;  %v1091_v63 = vmul.f32 %v2317_v17, %v897_v59  ;;  %v1123_v0 = vmul.f32 %v2317_v17, %v1025_v60  ;;  %v899_v1 = vpop.f32.mrb[47].mxu0  ;;  %v1027_v2 = vpop.f32.mrb[47].mxu1 }
 0x1f7   : > { %v1225_v3 = vmax.f32 %v1161_v61, 0.0  ;;  %v1257_v4 = vmax.f32 %v1193_v62, 0.0  ;;  %v1162_v5 = vadd.f32 %v2319_v19, %v1091_v63  ;;  %v1194_v6 = vadd.f32 %v2319_v19, %v1123_v0 }
 0x1f9   : > { %1289 = vst [vmem:[%s2331_s21 + $0xb0] sm:$0xff] %v1225_v3  ;;  %1321 = vst [vmem:[%s2331_s21 + $0x1b0] sm:$0xff] %v1257_v4  ;;  %v1226_v7 = vmax.f32 %v1162_v5, 0.0  ;;  %v1258_v8 = vmax.f32 %v1194_v6, 0.0 }
 0x1fa   : > { %v902_v9 = vpop.f32.mrb[48].mxu0  ;;  %v1030_v10 = vpop.f32.mrb[48].mxu1 }
 0x1fb   : > { %1290 = vst [vmem:[%s2331_s21 + $0xb8] sm:$0xff] %v1226_v7  ;;  %1322 = vst [vmem:[%s2331_s21 + $0x1b8] sm:$0xff] %v1258_v8  ;;  %v1092_v11 = vmul.f32 %v2317_v17, %v902_v9  ;;  %v1124_v12 = vmul.f32 %v2317_v17, %v1030_v10  ;;  %v904_v13 = vpop.f32.mrb[49].mxu0  ;;  %v1032_v14 = vpop.f32.mrb[49].mxu1 }
 0x1fc   : > { %v905_v15 = vpop.f32.mrb[50].mxu0  ;;  %v1033_v16 = vpop.f32.mrb[50].mxu1 }
 0x1fd   : > { %v1163_v18 = vadd.f32 %v2319_v19, %v1092_v11  ;;  %v1195_v20 = vadd.f32 %v2319_v19, %v1124_v12  ;;  %v1093_v21 = vmul.f32 %v2317_v17, %v905_v15  ;;  %v1125_v22 = vmul.f32 %v2317_v17, %v1033_v16  ;;  %v907_v23 = vpop.f32.mrb[51].mxu0  ;;  %v1035_v24 = vpop.f32.mrb[51].mxu1 }
 0x1ff   : > { %v1227_v25 = vmax.f32 %v1163_v18, 0.0  ;;  %v1259_v26 = vmax.f32 %v1195_v20, 0.0  ;;  %v1164_v27 = vadd.f32 %v2319_v19, %v1093_v21  ;;  %v1196_v28 = vadd.f32 %v2319_v19, %v1125_v22 }
 0x201   : > { %1291 = vst [vmem:[%s2331_s21 + $0xc0] sm:$0xff] %v1227_v25  ;;  %1323 = vst [vmem:[%s2331_s21 + $0x1c0] sm:$0xff] %v1259_v26  ;;  %v1228_v29 = vmax.f32 %v1164_v27, 0.0  ;;  %v1260_v30 = vmax.f32 %v1196_v28, 0.0 }
 0x202   : > { %v910_v31 = vpop.f32.mrb[52].mxu0  ;;  %v1038_v32 = vpop.f32.mrb[52].mxu1 }
 0x203   : > { %1292 = vst [vmem:[%s2331_s21 + $0xc8] sm:$0xff] %v1228_v29  ;;  %1324 = vst [vmem:[%s2331_s21 + $0x1c8] sm:$0xff] %v1260_v30  ;;  %v1094_v33 = vmul.f32 %v2317_v17, %v910_v31  ;;  %v1126_v34 = vmul.f32 %v2317_v17, %v1038_v32  ;;  %v912_v35 = vpop.f32.mrb[53].mxu0  ;;  %v1040_v36 = vpop.f32.mrb[53].mxu1 }
 0x204   : > { %v913_v37 = vpop.f32.mrb[54].mxu0  ;;  %v1041_v38 = vpop.f32.mrb[54].mxu1 }
 0x205   : > { %v1165_v39 = vadd.f32 %v2319_v19, %v1094_v33  ;;  %v1197_v40 = vadd.f32 %v2319_v19, %v1126_v34  ;;  %v1095_v41 = vmul.f32 %v2317_v17, %v913_v37  ;;  %v1127_v42 = vmul.f32 %v2317_v17, %v1041_v38  ;;  %v915_v43 = vpop.f32.mrb[55].mxu0  ;;  %v1043_v44 = vpop.f32.mrb[55].mxu1 }
 0x207   : > { %v1229_v45 = vmax.f32 %v1165_v39, 0.0  ;;  %v1261_v46 = vmax.f32 %v1197_v40, 0.0  ;;  %v1166_v47 = vadd.f32 %v2319_v19, %v1095_v41  ;;  %v1198_v48 = vadd.f32 %v2319_v19, %v1127_v42 }
 0x209   : > { %1293 = vst [vmem:[%s2331_s21 + $0xd0] sm:$0xff] %v1229_v45  ;;  %1325 = vst [vmem:[%s2331_s21 + $0x1d0] sm:$0xff] %v1261_v46  ;;  %v1230_v49 = vmax.f32 %v1166_v47, 0.0  ;;  %v1262_v50 = vmax.f32 %v1198_v48, 0.0 }
 0x20a   : > { %v918_v51 = vpop.f32.mrb[56].mxu0  ;;  %v1046_v52 = vpop.f32.mrb[56].mxu1 }
 0x20b   : > { %1294 = vst [vmem:[%s2331_s21 + $0xd8] sm:$0xff] %v1230_v49  ;;  %1326 = vst [vmem:[%s2331_s21 + $0x1d8] sm:$0xff] %v1262_v50  ;;  %v1096_v53 = vmul.f32 %v2317_v17, %v918_v51  ;;  %v1128_v54 = vmul.f32 %v2317_v17, %v1046_v52  ;;  %v920_v55 = vpop.f32.mrb[57].mxu0  ;;  %v1048_v56 = vpop.f32.mrb[57].mxu1 }
 0x20c   : > { %v921_v57 = vpop.f32.mrb[58].mxu0  ;;  %v1049_v58 = vpop.f32.mrb[58].mxu1 }
 0x20d   : > { %v1167_v59 = vadd.f32 %v2319_v19, %v1096_v53  ;;  %v1199_v60 = vadd.f32 %v2319_v19, %v1128_v54  ;;  %v1097_v61 = vmul.f32 %v2317_v17, %v921_v57  ;;  %v1129_v62 = vmul.f32 %v2317_v17, %v1049_v58  ;;  %v923_v63 = vpop.f32.mrb[59].mxu0  ;;  %v1051_v0 = vpop.f32.mrb[59].mxu1 }
 0x20f   : > { %v1231_v1 = vmax.f32 %v1167_v59, 0.0  ;;  %v1263_v2 = vmax.f32 %v1199_v60, 0.0  ;;  %v1168_v3 = vadd.f32 %v2319_v19, %v1097_v61  ;;  %v1200_v4 = vadd.f32 %v2319_v19, %v1129_v62 }
 0x211   : > { %1295 = vst [vmem:[%s2331_s21 + $0xe0] sm:$0xff] %v1231_v1  ;;  %1327 = vst [vmem:[%s2331_s21 + $0x1e0] sm:$0xff] %v1263_v2  ;;  %v1232_v5 = vmax.f32 %v1168_v3, 0.0  ;;  %v1264_v6 = vmax.f32 %v1200_v4, 0.0 }
 0x212   : > { %v926_v7 = vpop.f32.mrb[60].mxu0  ;;  %v1054_v8 = vpop.f32.mrb[60].mxu1 }
 0x213   : > { %1296 = vst [vmem:[%s2331_s21 + $0xe8] sm:$0xff] %v1232_v5  ;;  %1328 = vst [vmem:[%s2331_s21 + $0x1e8] sm:$0xff] %v1264_v6  ;;  %v1098_v9 = vmul.f32 %v2317_v17, %v926_v7  ;;  %v1130_v10 = vmul.f32 %v2317_v17, %v1054_v8  ;;  %v928_v11 = vpop.f32.mrb[61].mxu0  ;;  %v1056_v12 = vpop.f32.mrb[61].mxu1 }
 0x214   : > { %v929_v13 = vpop.f32.mrb[62].mxu0  ;;  %v1057_v14 = vpop.f32.mrb[62].mxu1 }
 0x215   : > { %v1169_v15 = vadd.f32 %v2319_v19, %v1098_v9  ;;  %v1201_v16 = vadd.f32 %v2319_v19, %v1130_v10  ;;  %v1099_v18 = vmul.f32 %v2317_v17, %v929_v13  ;;  %v1131_v20 = vmul.f32 %v2317_v17, %v1057_v14  ;;  %v931_v21 = vpop.f32.mrb[63].mxu0  ;;  %v1059_v22 = vpop.f32.mrb[63].mxu1 }
 0x217   : > { %v1233_v23 = vmax.f32 %v1169_v15, 0.0  ;;  %v1265_v24 = vmax.f32 %v1201_v16, 0.0  ;;  %v1170_v25 = vadd.f32 %v2319_v19, %v1099_v18  ;;  %v1202_v26 = vadd.f32 %v2319_v19, %v1131_v20 }
 0x219   : > { %1297 = vst [vmem:[%s2331_s21 + $0xf0] sm:$0xff] %v1233_v23  ;;  %1329 = vst [vmem:[%s2331_s21 + $0x1f0] sm:$0xff] %v1265_v24  ;;  %v1234_v17 = vmax.f32 %v1170_v25, 0.0  ;;  %v1266_v27 = vmax.f32 %v1202_v26, 0.0 }
 0x21b   : > { %1298 = vst [vmem:[%s2331_s21 + $0xf8] sm:$0xff] %v1234_v17  ;;  %1330 = vst [vmem:[%s2331_s21 + $0x1f8] sm:$0xff] %v1266_v27 }
 0x21c   : > { %1908 = shalt.err (!%p1905_p4)
}
 0x21d   : > { %s1909_s27 = scalar_lea.hbm %s2518_s8, 8192  ;;  %s1913_s11 = scalar_lea.hbm %s2571_s4, 65536 }
 0x21e   : > { %p1910_p9 = scmp.ne.s32.totalorder %s2518_s8, %s1909_s27  ;;  %p1914_p8 = scmp.lt.u32.totalorder %s2518_s8, %s2571_s4 }
 0x21f   : > { %p1915_p12 = scmp.lt.u32.totalorder %s1913_s11, %s1909_s27  ;;  %p1917_p0 = scmp.lt.u32.totalorder %s1909_s27, %s2518_s8 }
 0x220   : > { %p1911_p13 = pnand %p1910_p9, %p2153_p5 }
 0x221   : > { %p1916_p6 = por %p1915_p12, %p1914_p8 }
 0x222   : > { %p1912_p10 = pneg %p1911_p13 }
 0x223   : > { %p1918_p3 = por %p1917_p0, %p1916_p6 }
 0x225   : > { %p1919_p7 = pnand %p1918_p3, %p1912_p10 }
 0x227   : > { %1922 = shalt.err (!%p1919_p7)
}
 0x228   : > { %s1981_s21 = smov 128   ;;  %s1982_s23 = smov 8  }
 0x229   : > { %1599 = dma.vmem_to_hbm [thread:$0]  (%p2153_p5), %s2520_s29, 8192, %s2518_s8, %s1332_s19, %s1981_s21, %s1981_s21, %s1982_s23  }
 0x22a PF: > { %p1626_p11 = scmp.ge.s32.totalorder %s1969_s18, 2  ;;  %s1360_s6 = sand.u32 1, %s1957_s15  }
 0x22b   : > { %p2589_p2 = scmp.ne.s32.totalorder %s2576_s22, 0  ;;  %s1361_s7 = scalar_lea.sflag [#allocation4], %s1360_s6 }
 0x22d   : > { %p1616_p1 = pnand %p1626_p11, %p2589_p2 }
 0x22f   : > { %1952 = dma.done.wait (!%p1616_p1), %s1361_s7, 8192  }
 0x230   : > { %1954 = vsyncadd (!%p1616_p1), %s1361_s7, 4294959104  ;;  %p19_p4 = scmp.ge.s32.totalorder %s2139_s10, 10   ;;  %s2590_s15 = smov %s1961_s16 }
 0x231   : > { %s2591_s16 = smov %s1965_s17  ;;  %s2592_s17 = smov %s2149_s12 }
 0x232   : > { %s2593_s18 = smov %s2139_s10  ;;  %21 = sbr.rel (!%p19_p4) target bundleno = 7 (0x7), region = 93 }
 0x239   :  { %1366 = vsyncpa [#allocation3], 1 }
 0x23a   :  { %1368 = vsyncpa [#allocation3 + $0x1], 1 }
 0x23b   :  { %1369 = vsyncpa [#allocation6], 1 }
 0x23c   :  { %1370 = vsyncpa [#allocation9], 1 }
 0x23d   :  { %1371 = vsyncpa [#allocation4], 1 }
 0x23e   :  { %1373 = vsyncpa [#allocation4 + $0x1], 1 }

</bundles_post_ra>
